<compile_context>
chip_gen: v5e
topology: v5e:2x2
jax: 0.10.0
libtpu: 0.0.40
codegen_flags: <defaults>
</compile_context>

<pallas_src>
import jax
import jax.numpy as jnp
import numpy as np
from jax.experimental import pallas as pl
from jax.experimental.pallas import tpu as pltpu


def encoder_kernel(x_ref,
                   wst_ref, bst_ref,
                   wea_ref, bea_ref,
                   web_ref, beb_ref,
                   wec_ref, bec_ref,
                   we2_ref, be2_ref,
                   wc2_ref, bc2_ref,
                   wc3_ref, bc3_ref,
                   o_ref):
    f32 = jnp.float32
    bf16 = jnp.bfloat16

    x = x_ref[...]                                                        # (tm, 128) bf16
    h = jnp.dot(x, wst_ref[...], preferred_element_type=f32) + bst_ref[...]
    h2 = h + h                                                            # doubled residual (in-place += in PyTorch)
    hb = h.astype(bf16)
    # The 2x factors of the doubled activations are folded into wea/web/wec
    # in the wrapper (exact: multiplying bf16 weights by 2 is lossless).
    a = jnp.maximum(jnp.dot(hb, wea_ref[...], preferred_element_type=f32) + bea_ref[...], 0.0)
    b = jnp.maximum(jnp.dot(a.astype(bf16), web_ref[...], preferred_element_type=f32) + beb_ref[...], 0.0)
    c = jnp.maximum(jnp.dot(b.astype(bf16), wec_ref[...], preferred_element_type=f32) + bec_ref[...], 0.0)
    d = jnp.maximum(jnp.dot((c + h2).astype(bf16), we2_ref[...], preferred_element_type=f32) + be2_ref[...], 0.0)
    e = jnp.dot(d.astype(bf16), wc2_ref[...], preferred_element_type=f32) + bc2_ref[...]
    # conv3 is zero-padded to 128 output lanes -> unmasked lane-dense store.
    o_ref[...] = jax.nn.sigmoid(
        jnp.dot(e.astype(bf16), wc3_ref[...], preferred_element_type=f32) + bc3_ref[...])


def init_params(key):
    """Deterministic init. Weights stored pre-transposed as (C_in, C_out); bias as (1, C_out)."""
    def conv1x1(key, c_in, c_out):
        kw, kb = jax.random.split(key)
        bound = 1.0 / np.sqrt(c_in)
        w = jax.random.uniform(kw, (c_in, c_out), jnp.float32, -bound, bound)
        b = jax.random.uniform(kb, (1, c_out), jnp.float32, -bound, bound)
        return w, b

    keys = jax.random.split(key, 7)
    p = {}
    p["start"] = conv1x1(keys[0], 128, 256)   # Encoder.start
    p["endA"]  = conv1x1(keys[1], 256, 256)   # BasicBlock_1[0].end
    p["endB"]  = conv1x1(keys[2], 256, 256)   # BasicBlock_1[1].end
    p["endC"]  = conv1x1(keys[3], 256, 256)   # BasicBlock_1[2].end
    p["end2"]  = conv1x1(keys[4], 256, 256)   # BasicBlock_2.end
    p["conv2"] = conv1x1(keys[5], 256, 512)   # Encoder.conv2
    p["conv3"] = conv1x1(keys[6], 512, 24)    # Encoder.conv3
    # TODO(synk): BasicBlock_0's k=3 conv/tanh/sigmoid branches and its `end` conv
    # are dead code (BasicBlock_0 returns its input) and are intentionally omitted.
    return p


def _round_up(a, b):
    return ((a + b - 1) // b) * b


def encoder_forward(x_ncl, params, *, max_tile=1024):
    N, c_in, L = x_ncl.shape
    assert c_in == 128, "Encoder expects 128 input channels"
    M = N * L

    # --- row tiling -----------------------------------------------------------
    # Big tiles amortize the ~0.35us per-grid-step overhead; keep the row tile a
    # multiple of 16 (bf16 sublane packing) and aim for >=2 grid steps so both
    # TensorCores of a dual-core chip (v7x) get work with ("parallel",) semantics.
    n_steps = max(1, -(-M // max_tile))
    if M > 16 and n_steps == 1:
        n_steps = 2
    tm = min(max_tile, _round_up(-(-M // n_steps), 16))
    M_pad = _round_up(M, tm)
    grid = M_pad // tm

    # --- input prep (NCL -> rows x channels, zero-padded rows, bf16) ----------
    # TODO(synk): for large N*L, accept channel-last input upstream to avoid this
    # HBM transpose round-trip; the kernel itself is compute-bound so it is minor.
    x2d = jnp.transpose(x_ncl, (0, 2, 1)).reshape(M, c_in)
    if M_pad != M:
        x2d = jnp.pad(x2d, ((0, M_pad - M), (0, 0)))
    x2d = x2d.astype(jnp.bfloat16)

    # --- weight prep -----------------------------------------------------------
    wst, bst = params["start"]
    wea, bea = params["endA"]
    web, beb = params["endB"]
    wec, bec = params["endC"]
    we2, be2 = params["end2"]
    wc2, bc2 = params["conv2"]
    wc3, bc3 = params["conv3"]

    # Fold the static doubling of the aliased residual path into the next weight
    # matrix (exact in bf16: scaling by a power of two is lossless).
    wea = 2.0 * wea
    web = 2.0 * web
    wec = 2.0 * wec

    # Pad the 24-channel head to 128 lanes so the output store is unmasked.
    wc3p = jnp.zeros((512, 128), jnp.float32).at[:, :24].set(wc3)
    bc3p = jnp.zeros((1, 128), jnp.float32).at[:, :24].set(bc3)

    weights = [wst, wea, web, wec, we2, wc2, wc3p]
    biases = [bst, bea, beb, bec, be2, bc2, bc3p]

    flat_args = []
    in_specs = [pl.BlockSpec((tm, 128), lambda i: (i, 0))]
    for w, b in zip(weights, biases):
        wb = w.astype(jnp.bfloat16)          # bf16 MXU operands, f32 accumulate
        bb = b.astype(jnp.float32)           # biases stay f32 (tiny)
        flat_args += [wb, bb]
        in_specs += [pl.BlockSpec(wb.shape, lambda i: (0, 0)),
                     pl.BlockSpec(bb.shape, lambda i: (0, 0))]

    # --- scheduler hint --------------------------------------------------------
    flops_per_row = 2 * (128 * 256 + 3 * 256 * 256 + 256 * 256 + 256 * 512 + 512 * 128)
    weight_bytes = sum(int(w.size) for w in weights) * 2 + sum(int(b.size) for b in biases) * 4
    cost = pl.CostEstimate(
        flops=int(M_pad) * flops_per_row,
        transcendentals=int(M_pad) * 128,
        bytes_accessed=int(M_pad) * 128 * 2 + int(M_pad) * 128 * 4 + weight_bytes,
    )

    out2d = pl.pallas_call(
        encoder_kernel,
        out_shape=jax.ShapeDtypeStruct((M_pad, 128), jnp.float32),
        grid=(grid,),
        in_specs=in_specs,
        out_specs=pl.BlockSpec((tm, 128), lambda i: (i, 0)),
        compiler_params=pltpu.CompilerParams(
            dimension_semantics=("parallel",),
            vmem_limit_bytes=32 * 1024 * 1024,   # covers tm=1024 on v5e's 16MiB default
        ),
        cost_estimate=cost,
    )(x2d, *flat_args)

    y2d = out2d[:M, :24]                                   # drop row/lane padding
    return jnp.transpose(y2d.reshape(N, L, 24), (0, 2, 1))  # back to NCL


def encoder_reference(x_ncl, params):
    """Pure-JAX reference of the same live-path computation, using the same
    bf16-operand / f32-accumulation matmul numerics as the kernel."""
    bf16 = jnp.bfloat16
    x2d = jnp.transpose(x_ncl, (0, 2, 1)).reshape(-1, x_ncl.shape[1])

    def lin(x, name):
        w, b = params[name]
        return jnp.dot(x.astype(bf16), w.astype(bf16),
                       preferred_element_type=jnp.float32) + b

    h = lin(x2d, "start")
    h2 = 2.0 * h
    a = jax.nn.relu(lin(h2, "endA"))
    b = jax.nn.relu(lin(2.0 * a, "endB"))
    c = jax.nn.relu(lin(2.0 * b, "endC"))
    d = jax.nn.relu(lin(c + h2, "end2"))
    e = lin(d, "conv2")
    y = jax.nn.sigmoid(lin(e, "conv3"))
    N, _, L = x_ncl.shape
    return jnp.transpose(y.reshape(N, L, 24), (0, 2, 1))


if __name__ == "__main__":
    key = jax.random.PRNGKey(0)
    k_param, k_x = jax.random.split(key)

    params = init_params(k_param)
    # Input matching nn.Conv1d(128, ...): (batch=2, channels=128, length=16)
    x = jax.random.normal(k_x, (2, 128, 16), dtype=jnp.float32)

    y = jax.block_until_ready(encoder_forward(x, params))
    y_ref = jax.block_until_ready(encoder_reference(x, params))

    assert y.shape == (2, 24, 16), y.shape
    np.testing.assert_allclose(np.asarray(y), np.asarray(y_ref), rtol=2e-3, atol=2e-3)
    print("KERNEL_OK")
</pallas_src>

<mosaic_0001>
module attributes {stable_mosaic.version = 11 : i64} {
  func.func @encoder_kernel(%arg0: i32, %arg1: memref<16x128xbf16, #tpu.memory_space<vmem>>, %arg2: memref<128x256xbf16, #tpu.memory_space<vmem>>, %arg3: memref<1x256xf32, #tpu.memory_space<vmem>>, %arg4: memref<256x256xbf16, #tpu.memory_space<vmem>>, %arg5: memref<1x256xf32, #tpu.memory_space<vmem>>, %arg6: memref<256x256xbf16, #tpu.memory_space<vmem>>, %arg7: memref<1x256xf32, #tpu.memory_space<vmem>>, %arg8: memref<256x256xbf16, #tpu.memory_space<vmem>>, %arg9: memref<1x256xf32, #tpu.memory_space<vmem>>, %arg10: memref<256x256xbf16, #tpu.memory_space<vmem>>, %arg11: memref<1x256xf32, #tpu.memory_space<vmem>>, %arg12: memref<256x512xbf16, #tpu.memory_space<vmem>>, %arg13: memref<1x512xf32, #tpu.memory_space<vmem>>, %arg14: memref<512x128xbf16, #tpu.memory_space<vmem>>, %arg15: memref<1x128xf32, #tpu.memory_space<vmem>>, %arg16: memref<16x128xf32, #tpu.memory_space<vmem>>) attributes {dimension_semantics = [#tpu.dimension_semantics<parallel>], iteration_bounds = array<i64: 2>, scalar_prefetch = 0 : i64, scratch_operands = 0 : i64, tpu.core_type = #tpu.core_type<tc>, window_params = [{transform_indices = @transform_0, window_bounds = array<i64: 16, 128>}, {pipeline_mode = #tpu.pipeline_mode<synchronous>, transform_indices = @transform_1, window_bounds = array<i64: 128, 256>}, {pipeline_mode = #tpu.pipeline_mode<synchronous>, transform_indices = @transform_2, window_bounds = array<i64: 1, 256>}, {pipeline_mode = #tpu.pipeline_mode<synchronous>, transform_indices = @transform_3, window_bounds = array<i64: 256, 256>}, {pipeline_mode = #tpu.pipeline_mode<synchronous>, transform_indices = @transform_4, window_bounds = array<i64: 1, 256>}, {pipeline_mode = #tpu.pipeline_mode<synchronous>, transform_indices = @transform_5, window_bounds = array<i64: 256, 256>}, {pipeline_mode = #tpu.pipeline_mode<synchronous>, transform_indices = @transform_6, window_bounds = array<i64: 1, 256>}, {pipeline_mode = #tpu.pipeline_mode<synchronous>, transform_indices = @transform_7, window_bounds = array<i64: 256, 256>}, {pipeline_mode = #tpu.pipeline_mode<synchronous>, transform_indices = @transform_8, window_bounds = array<i64: 1, 256>}, {pipeline_mode = #tpu.pipeline_mode<synchronous>, transform_indices = @transform_9, window_bounds = array<i64: 256, 256>}, {pipeline_mode = #tpu.pipeline_mode<synchronous>, transform_indices = @transform_10, window_bounds = array<i64: 1, 256>}, {pipeline_mode = #tpu.pipeline_mode<synchronous>, transform_indices = @transform_11, window_bounds = array<i64: 256, 512>}, {pipeline_mode = #tpu.pipeline_mode<synchronous>, transform_indices = @transform_12, window_bounds = array<i64: 1, 512>}, {pipeline_mode = #tpu.pipeline_mode<synchronous>, transform_indices = @transform_13, window_bounds = array<i64: 512, 128>}, {pipeline_mode = #tpu.pipeline_mode<synchronous>, transform_indices = @transform_14, window_bounds = array<i64: 1, 128>}, {transform_indices = @transform_15, window_bounds = array<i64: 16, 128>}]} {
    %c0 = arith.constant 0 : index
    %c0_0 = arith.constant 0 : index
    %0 = vector.load %arg1[%c0, %c0_0] : memref<16x128xbf16, #tpu.memory_space<vmem>>, vector<16x128xbf16>
    %c0_1 = arith.constant 0 : index
    %c0_2 = arith.constant 0 : index
    %1 = vector.load %arg2[%c0_1, %c0_2] : memref<128x256xbf16, #tpu.memory_space<vmem>>, vector<128x256xbf16>
    %cst = arith.constant dense<0.000000e+00> : vector<16x256xf32>
    %2 = tpu.matmul %0, %1, %cst {dimension_numbers = #tpu.dot_dimension_numbers<[1], [0], [0], [1], [0, 0, 1, 1], [], []>} : vector<16x128xbf16>, vector<128x256xbf16>, vector<16x256xf32> -> vector<16x256xf32>
    %c0_3 = arith.constant 0 : index
    %c0_4 = arith.constant 0 : index
    %3 = vector.load %arg3[%c0_3, %c0_4] : memref<1x256xf32, #tpu.memory_space<vmem>>, vector<1x256xf32>
    %4 = vector.broadcast %3 : vector<1x256xf32> to vector<16x256xf32>
    %5 = arith.addf %2, %4 : vector<16x256xf32>
    %6 = arith.addf %5, %5 : vector<16x256xf32>
    %7 = arith.truncf %5 : vector<16x256xf32> to vector<16x256xbf16>
    %c0_5 = arith.constant 0 : index
    %c0_6 = arith.constant 0 : index
    %8 = vector.load %arg4[%c0_5, %c0_6] : memref<256x256xbf16, #tpu.memory_space<vmem>>, vector<256x256xbf16>
    %cst_7 = arith.constant dense<0.000000e+00> : vector<16x256xf32>
    %9 = tpu.matmul %7, %8, %cst_7 {dimension_numbers = #tpu.dot_dimension_numbers<[1], [0], [0], [1], [0, 0, 1, 1], [], []>} : vector<16x256xbf16>, vector<256x256xbf16>, vector<16x256xf32> -> vector<16x256xf32>
    %c0_8 = arith.constant 0 : index
    %c0_9 = arith.constant 0 : index
    %10 = vector.load %arg5[%c0_8, %c0_9] : memref<1x256xf32, #tpu.memory_space<vmem>>, vector<1x256xf32>
    %11 = vector.broadcast %10 : vector<1x256xf32> to vector<16x256xf32>
    %12 = arith.addf %9, %11 : vector<16x256xf32>
    %cst_10 = arith.constant 0.000000e+00 : f32
    %13 = vector.broadcast %cst_10 : f32 to vector<16x256xf32>
    %14 = arith.maximumf %12, %13 : vector<16x256xf32>
    %15 = arith.truncf %14 : vector<16x256xf32> to vector<16x256xbf16>
    %c0_11 = arith.constant 0 : index
    %c0_12 = arith.constant 0 : index
    %16 = vector.load %arg6[%c0_11, %c0_12] : memref<256x256xbf16, #tpu.memory_space<vmem>>, vector<256x256xbf16>
    %cst_13 = arith.constant dense<0.000000e+00> : vector<16x256xf32>
    %17 = tpu.matmul %15, %16, %cst_13 {dimension_numbers = #tpu.dot_dimension_numbers<[1], [0], [0], [1], [0, 0, 1, 1], [], []>} : vector<16x256xbf16>, vector<256x256xbf16>, vector<16x256xf32> -> vector<16x256xf32>
    %c0_14 = arith.constant 0 : index
    %c0_15 = arith.constant 0 : index
    %18 = vector.load %arg7[%c0_14, %c0_15] : memref<1x256xf32, #tpu.memory_space<vmem>>, vector<1x256xf32>
    %19 = vector.broadcast %18 : vector<1x256xf32> to vector<16x256xf32>
    %20 = arith.addf %17, %19 : vector<16x256xf32>
    %cst_16 = arith.constant 0.000000e+00 : f32
    %21 = vector.broadcast %cst_16 : f32 to vector<16x256xf32>
    %22 = arith.maximumf %20, %21 : vector<16x256xf32>
    %23 = arith.truncf %22 : vector<16x256xf32> to vector<16x256xbf16>
    %c0_17 = arith.constant 0 : index
    %c0_18 = arith.constant 0 : index
    %24 = vector.load %arg8[%c0_17, %c0_18] : memref<256x256xbf16, #tpu.memory_space<vmem>>, vector<256x256xbf16>
    %cst_19 = arith.constant dense<0.000000e+00> : vector<16x256xf32>
    %25 = tpu.matmul %23, %24, %cst_19 {dimension_numbers = #tpu.dot_dimension_numbers<[1], [0], [0], [1], [0, 0, 1, 1], [], []>} : vector<16x256xbf16>, vector<256x256xbf16>, vector<16x256xf32> -> vector<16x256xf32>
    %c0_20 = arith.constant 0 : index
    %c0_21 = arith.constant 0 : index
    %26 = vector.load %arg9[%c0_20, %c0_21] : memref<1x256xf32, #tpu.memory_space<vmem>>, vector<1x256xf32>
    %27 = vector.broadcast %26 : vector<1x256xf32> to vector<16x256xf32>
    %28 = arith.addf %25, %27 : vector<16x256xf32>
    %cst_22 = arith.constant 0.000000e+00 : f32
    %29 = vector.broadcast %cst_22 : f32 to vector<16x256xf32>
    %30 = arith.maximumf %28, %29 : vector<16x256xf32>
    %31 = arith.addf %30, %6 : vector<16x256xf32>
    %32 = arith.truncf %31 : vector<16x256xf32> to vector<16x256xbf16>
    %c0_23 = arith.constant 0 : index
    %c0_24 = arith.constant 0 : index
    %33 = vector.load %arg10[%c0_23, %c0_24] : memref<256x256xbf16, #tpu.memory_space<vmem>>, vector<256x256xbf16>
    %cst_25 = arith.constant dense<0.000000e+00> : vector<16x256xf32>
    %34 = tpu.matmul %32, %33, %cst_25 {dimension_numbers = #tpu.dot_dimension_numbers<[1], [0], [0], [1], [0, 0, 1, 1], [], []>} : vector<16x256xbf16>, vector<256x256xbf16>, vector<16x256xf32> -> vector<16x256xf32>
    %c0_26 = arith.constant 0 : index
    %c0_27 = arith.constant 0 : index
    %35 = vector.load %arg11[%c0_26, %c0_27] : memref<1x256xf32, #tpu.memory_space<vmem>>, vector<1x256xf32>
    %36 = vector.broadcast %35 : vector<1x256xf32> to vector<16x256xf32>
    %37 = arith.addf %34, %36 : vector<16x256xf32>
    %cst_28 = arith.constant 0.000000e+00 : f32
    %38 = vector.broadcast %cst_28 : f32 to vector<16x256xf32>
    %39 = arith.maximumf %37, %38 : vector<16x256xf32>
    %40 = arith.truncf %39 : vector<16x256xf32> to vector<16x256xbf16>
    %c0_29 = arith.constant 0 : index
    %c0_30 = arith.constant 0 : index
    %41 = vector.load %arg12[%c0_29, %c0_30] : memref<256x512xbf16, #tpu.memory_space<vmem>>, vector<256x512xbf16>
    %cst_31 = arith.constant dense<0.000000e+00> : vector<16x512xf32>
    %42 = tpu.matmul %40, %41, %cst_31 {dimension_numbers = #tpu.dot_dimension_numbers<[1], [0], [0], [1], [0, 0, 1, 1], [], []>} : vector<16x256xbf16>, vector<256x512xbf16>, vector<16x512xf32> -> vector<16x512xf32>
    %c0_32 = arith.constant 0 : index
    %c0_33 = arith.constant 0 : index
    %43 = vector.load %arg13[%c0_32, %c0_33] : memref<1x512xf32, #tpu.memory_space<vmem>>, vector<1x512xf32>
    %44 = vector.broadcast %43 : vector<1x512xf32> to vector<16x512xf32>
    %45 = arith.addf %42, %44 : vector<16x512xf32>
    %46 = arith.truncf %45 : vector<16x512xf32> to vector<16x512xbf16>
    %c0_34 = arith.constant 0 : index
    %c0_35 = arith.constant 0 : index
    %47 = vector.load %arg14[%c0_34, %c0_35] : memref<512x128xbf16, #tpu.memory_space<vmem>>, vector<512x128xbf16>
    %cst_36 = arith.constant dense<0.000000e+00> : vector<16x128xf32>
    %48 = tpu.matmul %46, %47, %cst_36 {dimension_numbers = #tpu.dot_dimension_numbers<[1], [0], [0], [1], [0, 0, 1, 1], [], []>} : vector<16x512xbf16>, vector<512x128xbf16>, vector<16x128xf32> -> vector<16x128xf32>
    %c0_37 = arith.constant 0 : index
    %c0_38 = arith.constant 0 : index
    %49 = vector.load %arg15[%c0_37, %c0_38] : memref<1x128xf32, #tpu.memory_space<vmem>>, vector<1x128xf32>
    %50 = vector.broadcast %49 : vector<1x128xf32> to vector<16x128xf32>
    %51 = arith.addf %48, %50 : vector<16x128xf32>
    %52 = arith.negf %51 : vector<16x128xf32>
    %53 = math.exp %52 : vector<16x128xf32>
    %cst_39 = arith.constant 1.000000e+00 : f32
    %54 = vector.broadcast %cst_39 : f32 to vector<16x128xf32>
    %55 = arith.addf %54, %53 : vector<16x128xf32>
    %56 = arith.divf %54, %55 : vector<16x128xf32>
    %c0_40 = arith.constant 0 : index
    %c0_41 = arith.constant 0 : index
    %57 = vector.load %arg16[%c0_40, %c0_41] : memref<16x128xf32, #tpu.memory_space<vmem>>, vector<16x128xf32>
    tpu.vector_store %arg16[%c0_40, %c0_41], %56 {strides = array<i32>} : memref<16x128xf32, #tpu.memory_space<vmem>>, vector<16x128xf32>,
    return
  }
  func.func @transform_0(%arg0: i32) -> (i32, i32) {
    %c0_i32 = arith.constant 0 : i32
    %c0_i32_0 = arith.constant 0 : i32
    return %arg0, %c0_i32 : i32, i32
  }
  func.func @transform_1(%arg0: i32) -> (i32, i32) {
    %c0_i32 = arith.constant 0 : i32
    %c0_i32_0 = arith.constant 0 : i32
    %c0_i32_1 = arith.constant 0 : i32
    return %c0_i32, %c0_i32_0 : i32, i32
  }
  func.func @transform_2(%arg0: i32) -> (i32, i32) {
    %c0_i32 = arith.constant 0 : i32
    %c0_i32_0 = arith.constant 0 : i32
    %c0_i32_1 = arith.constant 0 : i32
    return %c0_i32, %c0_i32_0 : i32, i32
  }
  func.func @transform_3(%arg0: i32) -> (i32, i32) {
    %c0_i32 = arith.constant 0 : i32
    %c0_i32_0 = arith.constant 0 : i32
    %c0_i32_1 = arith.constant 0 : i32
    return %c0_i32, %c0_i32_0 : i32, i32
  }
  func.func @transform_4(%arg0: i32) -> (i32, i32) {
    %c0_i32 = arith.constant 0 : i32
    %c0_i32_0 = arith.constant 0 : i32
    %c0_i32_1 = arith.constant 0 : i32
    return %c0_i32, %c0_i32_0 : i32, i32
  }
  func.func @transform_5(%arg0: i32) -> (i32, i32) {
    %c0_i32 = arith.constant 0 : i32
    %c0_i32_0 = arith.constant 0 : i32
    %c0_i32_1 = arith.constant 0 : i32
    return %c0_i32, %c0_i32_0 : i32, i32
  }
  func.func @transform_6(%arg0: i32) -> (i32, i32) {
    %c0_i32 = arith.constant 0 : i32
    %c0_i32_0 = arith.constant 0 : i32
    %c0_i32_1 = arith.constant 0 : i32
    return %c0_i32, %c0_i32_0 : i32, i32
  }
  func.func @transform_7(%arg0: i32) -> (i32, i32) {
    %c0_i32 = arith.constant 0 : i32
    %c0_i32_0 = arith.constant 0 : i32
    %c0_i32_1 = arith.constant 0 : i32
    return %c0_i32, %c0_i32_0 : i32, i32
  }
  func.func @transform_8(%arg0: i32) -> (i32, i32) {
    %c0_i32 = arith.constant 0 : i32
    %c0_i32_0 = arith.constant 0 : i32
    %c0_i32_1 = arith.constant 0 : i32
    return %c0_i32, %c0_i32_0 : i32, i32
  }
  func.func @transform_9(%arg0: i32) -> (i32, i32) {
    %c0_i32 = arith.constant 0 : i32
    %c0_i32_0 = arith.constant 0 : i32
    %c0_i32_1 = arith.constant 0 : i32
    return %c0_i32, %c0_i32_0 : i32, i32
  }
  func.func @transform_10(%arg0: i32) -> (i32, i32) {
    %c0_i32 = arith.constant 0 : i32
    %c0_i32_0 = arith.constant 0 : i32
    %c0_i32_1 = arith.constant 0 : i32
    return %c0_i32, %c0_i32_0 : i32, i32
  }
  func.func @transform_11(%arg0: i32) -> (i32, i32) {
    %c0_i32 = arith.constant 0 : i32
    %c0_i32_0 = arith.constant 0 : i32
    %c0_i32_1 = arith.constant 0 : i32
    return %c0_i32, %c0_i32_0 : i32, i32
  }
  func.func @transform_12(%arg0: i32) -> (i32, i32) {
    %c0_i32 = arith.constant 0 : i32
    %c0_i32_0 = arith.constant 0 : i32
    %c0_i32_1 = arith.constant 0 : i32
    return %c0_i32, %c0_i32_0 : i32, i32
  }
  func.func @transform_13(%arg0: i32) -> (i32, i32) {
    %c0_i32 = arith.constant 0 : i32
    %c0_i32_0 = arith.constant 0 : i32
    %c0_i32_1 = arith.constant 0 : i32
    return %c0_i32, %c0_i32_0 : i32, i32
  }
  func.func @transform_14(%arg0: i32) -> (i32, i32) {
    %c0_i32 = arith.constant 0 : i32
    %c0_i32_0 = arith.constant 0 : i32
    %c0_i32_1 = arith.constant 0 : i32
    return %c0_i32, %c0_i32_0 : i32, i32
  }
  func.func @transform_15(%arg0: i32) -> (i32, i32) {
    %c0_i32 = arith.constant 0 : i32
    %c0_i32_0 = arith.constant 0 : i32
    return %arg0, %c0_i32 : i32, i32
  }
}

</mosaic_0001>

<bundles_post_ra>
// kernel: tpu_custom_call.1
= control target key start
LH: loop header
LB: loop body
LE: loop exit
PB: predicated region body
PF: predicated region fallthrough
CT: control target
= control target key end

     0   :  { %s5107_s0 = inlined_call_operand.hbm [shape: bf16[32,128], index: 0, kind: input, shape index: {}]   ;;  %s5108_s1 = inlined_call_operand.hbm [shape: bf16[128,256], index: 1, kind: input, shape index: {}]   ;;  %s5109_s2 = inlined_call_operand.hbm [shape: f32[1,256], index: 2, kind: input, shape index: {}]   ;;  %s5110_s3 = inlined_call_operand.hbm [shape: bf16[256,256], index: 3, kind: input, shape index: {}]   ;;  %s5111_s4 = inlined_call_operand.vmem [shape: f32[1,256], index: 4, kind: input, shape index: {}]   ;;  %s5112_s5 = inlined_call_operand.hbm [shape: bf16[256,256], index: 5, kind: input, shape index: {}]   ;;  %s5113_s6 = inlined_call_operand.hbm [shape: f32[1,256], index: 6, kind: input, shape index: {}]   ;;  %s5114_s7 = inlined_call_operand.hbm [shape: bf16[256,256], index: 7, kind: input, shape index: {}]   ;;  %s5115_s8 = inlined_call_operand.hbm [shape: f32[1,256], index: 8, kind: input, shape index: {}]   ;;  %s5116_s9 = inlined_call_operand.hbm [shape: bf16[256,256], index: 9, kind: input, shape index: {}]   ;;  %s5117_s10 = inlined_call_operand.vmem [shape: f32[1,256], index: 10, kind: input, shape index: {}]   ;;  %s5118_s11 = inlined_call_operand.hbm [shape: bf16[256,512], index: 11, kind: input, shape index: {}]   ;;  %s5119_s12 = inlined_call_operand.vmem [shape: f32[1,512], index: 12, kind: input, shape index: {}]   ;;  %s5120_s13 = inlined_call_operand.hbm [shape: bf16[512,128], index: 13, kind: input, shape index: {}]   ;;  %s5121_s14 = inlined_call_operand.vmem [shape: f32[1,128], index: 14, kind: input, shape index: {}]   ;;  %s5122_s15 = inlined_call_operand.hbm [shape: f32[32,128], index: 15, kind: output, shape index: {}]  }
   0x1   :  { %5130 = sst [smem:[#allocation28_spill]] %s5108_s1 }
   0x2   :  { %5131 = sst [smem:[#allocation29_spill]] %s5109_s2 }
   0x3   :  { %5132 = sst [smem:[#allocation30_spill]] %s5110_s3 }
   0x4   :  { %5133 = sst [smem:[#allocation31_spill]] %s5112_s5 }
   0x5   :  { %5134 = sst [smem:[#allocation32_spill]] %s5113_s6 }
   0x6   :  { %5135 = sst [smem:[#allocation33_spill]] %s5114_s7 }
   0x7   :  { %5136 = sst [smem:[#allocation34_spill]] %s5117_s10 }
   0x8   :  { %5137 = sst [smem:[#allocation35_spill]] %s5119_s12 }
   0x9   :  { %5138 = sst [smem:[#allocation36_spill]] %s5121_s14 }
   0xa   :  { %5139 = sst [smem:[#allocation37_spill]] %s5122_s15 }
   0xb   :  { %20 = vsyncpa [#allocation3], 0 }
   0xc   :  { %22 = vsyncpa [#allocation3 + $0x1], 0 }
   0xd   :  { %23 = vsyncpa [#allocation6], 0 }
   0xe   :  { %24 = vsyncpa [#allocation9], 0 }
   0xf   :  { %25 = vsyncpa [#allocation12], 0 }
  0x10   :  { %26 = vsyncpa [#allocation15], 0 }
  0x11   :  { %27 = vsyncpa [#allocation18], 0 }
  0x12   :  { %28 = vsyncpa [#allocation4], 0 }
  0x13   :  { %30 = vsyncpa [#allocation4 + $0x1], 0  ;;  %s4837_s18 = smov 0   ;;  %s4839_s19 = smov 0  }
  0x14   :  { %s4841_s20 = smov 0   ;;  %s4843_s21 = smov 0  }
  0x15 LB: > { %s5140_s1 = sld [smem:[#allocation28_spill]]  ;;  %s4861_s25 = sadd.s32 4294967295, %s4737_s21   ;;  %s4737_s21 = sphi %s4843_s21, %s5165_s21   ;;  %s4733_s20 = sphi %s4841_s20, %s5164_s20   ;;  %s4729_s19 = sphi %s4839_s19, %s5163_s19   ;;  %s4725_s18 = sphi %s4837_s18, %s5162_s18  }
  0x16   : > { %p2915_p0 = scmp.ge.s32.totalorder %s4737_s21, 1  ;;  %p57_p1 = scmp.eq.s32.totalorder %s4861_s25, 0 }
  0x17   : > { %p387_p2 = scmp.lt.s32.totalorder %s4737_s21, 3  ;;  %s4739_s27 = smov [#allocation5]  }
  0x18   : > { %s400_s28 = sshll.u32 %s4739_s27, 4  ;;  %s5142_s3 = sld [smem:[#allocation30_spill]]  ;;  %s401_s28 = int_to_ptr.vmem [resolvable:$true] %s400_s28 }
  0x19   : > { %p4866_p3 = pnand %p2915_p0, %p387_p2  ;;  %s5144_s6 = sld [smem:[#allocation32_spill]] }
  0x1a   : > { %s5124_s14 = smov 128   ;;  %s5126_s12 = smov 8  }
  0x1b   : > { %s398_s24 = sshll.u32 %s5140_s1, 4  ;;  %p4201_p4 = pneg %p4866_p3  ;;  %s399_s24 = int_to_ptr.hbm [resolvable:$true] %s398_s24 }
  0x1c   : > { %s4740_s1 = smov [#allocation8]   ;;  %s482_s22 = sshll.u32 %s5115_s8, 4  ;;  %s483_s22 = int_to_ptr.hbm [resolvable:$true] %s482_s22 }
  0x1d   : > { %p4878_p6 = pnand %p4201_p4, %p57_p1  ;;  %s426_s15 = sshll.u32 %s4740_s1, 4  ;;  %s427_s15 = int_to_ptr.vmem [resolvable:$true] %s426_s15 }
  0x1e   : > { %s424_s16 = sshll.u32 %s5142_s3, 4  ;;  %s4743_s1 = smov [#allocation11]   ;;  %s425_s16 = int_to_ptr.hbm [resolvable:$true] %s424_s16 }
  0x1f   : > { %s456_s27 = sshll.u32 %s5144_s6, 4  ;;  %s458_s23 = sshll.u32 %s4743_s1, 4  ;;  %s457_s27 = int_to_ptr.hbm [resolvable:$true] %s456_s27  ;;  %s459_s23 = int_to_ptr.vmem [resolvable:$true] %s458_s23 }
  0x20   : > { %4204 = dma.hbm_to_vmem [thread:$0]  (!%p4878_p6), %s399_s24, 2048, %s401_s28, [#allocation6], %s5124_s14, %s5124_s14, %s5126_s12  }
  0x21   : > { %4210 = dma.hbm_to_vmem [thread:$0]  (!%p4878_p6), %s425_s16, 4096, %s427_s15, [#allocation9], %s5124_s14, %s5124_s14, %s5126_s12  }
  0x22   : > { %4216 = dma.hbm_to_vmem [thread:$0]  (!%p4878_p6), %s457_s27, 32, %s459_s23, [#allocation12]  }
  0x23   : > { %s4744_s3 = smov [#allocation14]   ;;  %s510_s10 = sshll.u32 %s5118_s11, 4  ;;  %s511_s10 = int_to_ptr.hbm [resolvable:$true] %s510_s10 }
  0x24   : > { %s484_s24 = sshll.u32 %s4744_s3, 4  ;;  %s4745_s15 = smov [#allocation17]   ;;  %s485_s24 = int_to_ptr.vmem [resolvable:$true] %s484_s24 }
  0x25   : > { %4222 = dma.hbm_to_vmem [thread:$0]  (!%p4878_p6), %s483_s22, 32, %s485_s24, [#allocation15]  }
  0x26   : > { %s512_s16 = sshll.u32 %s4745_s15, 4  ;;  %s5145_s2 = sld [smem:[#allocation29_spill]]  ;;  %s513_s16 = int_to_ptr.vmem [resolvable:$true] %s512_s16 }
  0x27   : > { %s4746_s27 = smov 256   ;;  %s4747_s23 = smov 16  }
  0x28   : > { %4228 = dma.hbm_to_vmem [thread:$0]  (!%p4878_p6), %s511_s10, 8192, %s513_s16, [#allocation18], %s4746_s27, %s4746_s27, %s4747_s23  }
  0x29   : > { %s4748_s3 = smov [#allocation7]   ;;  %s5146_s5 = sld [smem:[#allocation31_spill]] }
  0x2a   : > { %s415_s6 = sshll.u32 %s4748_s3, 4  ;;  %s5147_s7 = sld [smem:[#allocation33_spill]]  ;;  %s416_s6 = int_to_ptr.vmem [resolvable:$true] %s415_s6 }
  0x2b   : > { %s4749_s30 = smov [#allocation10]   ;;  %s5148_s10 = smov 8  }
  0x2c   : > { %s413_s1 = sshll.u32 %s5145_s2, 4  ;;  %s443_s12 = sshll.u32 %s4749_s30, 4  ;;  %s414_s1 = int_to_ptr.hbm [resolvable:$true] %s413_s1  ;;  %s444_s12 = int_to_ptr.vmem [resolvable:$true] %s443_s12 }
  0x2d   : > { %4207 = dma.hbm_to_vmem [thread:$0]  (!%p4878_p6), %s414_s1, 32, %s416_s6, [#allocation6]  }
  0x2e   : > { %s5149_s16 = smov 128   ;;  %s4750_s14 = smov [#allocation13]  }
  0x2f   : > { %s441_s22 = sshll.u32 %s5146_s5, 4  ;;  %s469_s27 = sshll.u32 %s4750_s14, 4  ;;  %s442_s22 = int_to_ptr.hbm [resolvable:$true] %s441_s22  ;;  %s470_s27 = int_to_ptr.vmem [resolvable:$true] %s469_s27 }
  0x30   : > { %s467_s29 = sshll.u32 %s5147_s7, 4  ;;  %s493_s1 = sshll.u32 %s5116_s9, 4  ;;  %s468_s29 = int_to_ptr.hbm [resolvable:$true] %s467_s29  ;;  %s494_s1 = int_to_ptr.hbm [resolvable:$true] %s493_s1 }
  0x31   : > { %4213 = dma.hbm_to_vmem [thread:$0]  (!%p4878_p6), %s442_s22, 4096, %s444_s12, [#allocation9], %s5149_s16, %s5149_s16, %s5148_s10  }
  0x32   : > { %4219 = dma.hbm_to_vmem [thread:$0]  (!%p4878_p6), %s468_s29, 4096, %s470_s27, [#allocation12], %s5149_s16, %s5149_s16, %s5148_s10  }
  0x33   : > { %s527_s12 = sshll.u32 %s5120_s13, 4  ;;  %s4751_s22 = smov [#allocation16]   ;;  %s528_s12 = int_to_ptr.hbm [resolvable:$true] %s527_s12 }
  0x34   : > { %s495_s24 = sshll.u32 %s4751_s22, 4  ;;  %s4752_s15 = smov [#allocation19]   ;;  %s496_s24 = int_to_ptr.vmem [resolvable:$true] %s495_s24 }
  0x35   : > { %4225 = dma.hbm_to_vmem [thread:$0]  (!%p4878_p6), %s494_s1, 4096, %s496_s24, [#allocation15], %s5149_s16, %s5149_s16, %s5148_s10  }
  0x36   : > { %s529_s29 = sshll.u32 %s4752_s15, 4  ;;  %s5128_s30 = smov 64   ;;  %s530_s29 = int_to_ptr.vmem [resolvable:$true] %s529_s29 }
  0x37   : > { %s5129_s14 = smov 4   ;;  %s2914_s27 = sadd.s32 4294967294, %s4737_s21  }
  0x38   : > { %4231 = dma.hbm_to_vmem [thread:$0]  (!%p4878_p6), %s528_s12, 4096, %s530_s29, [#allocation18], %s5128_s30, %s5128_s30, %s5129_s14  }
  0x39   : > { %s4946_s23 = sadd.s32 1, %s4737_s21   ;;  %s43_s10 = sadd.s32 1, %s4733_s20 }
  0x3a   : > { %s40_s3 = ssub.s32 %s4737_s21, %s4946_s23  ;;  %p50_p8 = scmp.ne.s32.totalorder %s4733_s20, %s4729_s19 }
  0x3b   : > { %p41_p7 = scmp.eq.s32.totalorder %s40_s3, 0  ;;  %p51_p9 = scmp.eq.s32.totalorder %s4737_s21, 0 }
  0x3c   : > { %p56_p10 = scmp.ne.s32.totalorder %s4729_s19, %s4725_s18  ;;  %p374_p13 = scmp.eq.s32.totalorder %s4861_s25, 1 }
  0x3d   : > { %s4957_s16 = scalar_select %p41_p7, %s4733_s20, %s43_s10  }
  0x3e   : > { %p4959_p11 = por %p51_p9, %p50_p8  ;;  %p4965_p12 = por %p57_p1, %p56_p10 }
  0x3f   : > { %p380_p0 = scmp.eq.s32.totalorder %s2914_s27, 1  ;;  %p4250_p2 = scmp.lt.s32.totalorder %s4737_s21, 2 }
  0x40   : > { %s546_s6 = sand.u32 1, %s4733_s20   ;;  %p4972_p4 = por %p374_p13, %p50_p8 }
  0x41   : > { %p4976_p6 = por %p380_p0, %p56_p10  ;;  %s2927_s22 = sshll.u32 %s546_s6, 3 }
  0x42   : > { %s3914_s24 = sshll.u32 %s4737_s21, 3  ;;  %s550_s10 = scalar_lea.vmem [#allocation2], %s2927_s22 }
  0x43   : > { %s555_s3 = scalar_lea.hbm %s5107_s0, %s3914_s24  ;;  %s558_s30 = sshll.u32 %s550_s10, 4  ;;  %s559_s30 = int_to_ptr.vmem [resolvable:$true] %s558_s30 }
  0x44   : > { %s556_s14 = sshll.u32 %s555_s3, 4  ;;  %p4986_p7 = pnand %p4250_p2, %p4959_p11  ;;  %s557_s14 = int_to_ptr.hbm [resolvable:$true] %s556_s14 }
  0x45   : > { %s547_s2 = scalar_lea.sflag [#allocation3], %s546_s6  ;;  %s4621_s5 = sshra.s32 %s557_s14, 4  ;;  %s4622_s5 = int_to_ptr.hbm [resolvable:$true] %s4621_s5 }
  0x46   : > { %s4623_s7 = scalar_lea.hbm %s4622_s5, 8  ;;  %p4625_p9 = pneg %p4986_p7 }
  0x47   : > { %p4624_p8 = scmp.ne.s32.totalorder %s4622_s5, %s4623_s7  ;;  %s4628_s15 = scalar_lea.hbm %s5107_s0, 16 }
  0x48   : > { %p4629_p11 = scmp.lt.s32.totalorder %s4622_s5, %s5107_s0  ;;  %p4630_p0 = scmp.lt.s32.totalorder %s4628_s15, %s4623_s7 }
  0x49   : > { %p4626_p10 = pnand %p4625_p9, %p4624_p8 }
  0x4a   : > { %p4631_p2 = por %p4630_p0, %p4629_p11 }
  0x4b   : > { %p4627_p13 = pneg %p4626_p10 }
  0x4d   : > { %p4632_p5 = pnand %p4631_p2, %p4627_p13 }
  0x4f   : > { %4635 = shalt.err (!%p4632_p5)
}
  0x50   : > { %s5155_s6 = smov 4   ;;  %s5156_s3 = smov 64  }
  0x51   : > { %4235 = dma.hbm_to_vmem [thread:$0]  (!%p4986_p7), %s557_s14, 128, %s559_s30, %s547_s2, %s5156_s3, %s5156_s3, %s5155_s6  }
  0x52   : > { %570 = sbr.rel (%p4866_p3) target bundleno = 1196 (0x4ac), region = 80  ;;  %s5006_s10 = sand.u32 (!%p4866_p3), 1, %s4729_s19  }
  0x53   : > { %s2931_s5 = sshll.u32 (!%p4866_p3), %s5006_s10, 3  ;;  %s573_s7 = scalar_lea.sflag (!%p4866_p3), [#allocation3], %s5006_s10 }
  0x54   : > { %s5010_s22 = scalar_lea.vmem (!%p4866_p3), [#allocation2], %s2931_s5 }
  0x57   : > { %4696 = dma.done.wait (%p4965_p12), %s573_s7, 128  }
  0x58   : > { %4698 = vsyncadd (%p4965_p12), %s573_s7, 4294967168 }
  0x59   : > { %4700 = dma.done.wait (%p57_p1), [#allocation6], 2080  }
  0x5a   : > { %4702 = vsyncadd (%p57_p1), [#allocation6], 4294965216 }
  0x5b   : > { %4704 = dma.done.wait (%p57_p1), [#allocation9], 8192  }
  0x5c   : > { %4706 = vsyncadd (%p57_p1), [#allocation9], 4294959104 }
  0x5d   : > { %4708 = dma.done.wait (%p57_p1), [#allocation12], 4128  }
  0x5e   : > { %4710 = vsyncadd (%p57_p1), [#allocation12], 4294963168 }
  0x5f   : > { %4712 = dma.done.wait (%p57_p1), [#allocation15], 4128  }
  0x60   : > { %4714 = vsyncadd (%p57_p1), [#allocation15], 4294963168 }
  0x61   : > { %4716 = dma.done.wait (%p57_p1), [#allocation18], 12288  }
  0x62   : > { %4718 = vsyncadd (%p57_p1), [#allocation18], 4294955008  ;;  %v3005_v0 = vld [vmem:[#allocation5 + $0x70] sm:$0xf]  ;;  %v3931_v1 = vld [vmem:[#allocation5 + $0x74] sm:$0xf0] }
  0x63   : > { %v3930_v2 = vld [vmem:[#allocation5 + $0x74] sm:$0xf]  ;;  %v3006_v3 = vor.u32 %v3931_v1, %v3005_v0  ;;  %v3007_v4 = vld [vmem:[#allocation5 + $0x78] sm:$0xf0]  ;;  %v2997_v5 = vld [vmem:[#allocation5 + $0x60] sm:$0xf] }
  0x64   : > { %v3929_v6 = vld [vmem:[#allocation5 + $0x64] sm:$0xf0]  ;;  %v3010_v7 = vor.u32 %v3930_v2, %v3007_v4  ;;  %v3928_v8 = vld [vmem:[#allocation5 + $0x64] sm:$0xf]  ;;  %v2999_v9 = vld [vmem:[#allocation5 + $0x68] sm:$0xf0] }
  0x65   : > { %786 = vmatpush.bf16.msra.mxu0 %v3006_v3  ;;  %v2998_v10 = vor.u32 %v3929_v6, %v2997_v5  ;;  %v3002_v11 = vor.u32 %v3928_v8, %v2999_v9  ;;  %v2989_v12 = vld [vmem:[#allocation5 + $0x50] sm:$0xf]  ;;  %v3927_v13 = vld [vmem:[#allocation5 + $0x54] sm:$0xf0]  ;;  %v3926_v14 = vld [vmem:[#allocation5 + $0x54] sm:$0xf] }
  0x66   : > { %800 = vmatpush.bf16.msra.mxu1 %v3010_v7  ;;  %v2991_v15 = vld [vmem:[#allocation5 + $0x58] sm:$0xf0]  ;;  %v2990_v16 = vor.u32 %v3927_v13, %v2989_v12  ;;  %v2981_v18 = vld [vmem:[#allocation5 + $0x40] sm:$0xf]  ;;  %v3925_v19 = vld [vmem:[#allocation5 + $0x44] sm:$0xf0] }
  0x67   : > { %v2994_v17 = vor.u32 %v3926_v14, %v2991_v15  ;;  %v3924_v20 = vld [vmem:[#allocation5 + $0x44] sm:$0xf]  ;;  %v2983_v21 = vld [vmem:[#allocation5 + $0x48] sm:$0xf0]  ;;  %v2982_v22 = vor.u32 %v3925_v19, %v2981_v18  ;;  %v3069_v23 = vld [vmem:[#allocation8 + $0x70] sm:$0xf] }
  0x68   : > { %v3947_v24 = vld [vmem:[#allocation8 + $0x74] sm:$0xf0]  ;;  %v3133_v25 = vld [vmem:[#allocation8 + $0xf0] sm:$0xf]  ;;  %v2986_v26 = vor.u32 %v3924_v20, %v2983_v21  ;;  %v3061_v34 = vld [vmem:[#allocation8 + $0x60] sm:$0xf] }
  0x69   : > { %787 = vmatpush.bf16.msra.mxu0 %v2998_v10  ;;  %v2973_v27 = vld [vmem:[#allocation5 + $0x30] sm:$0xf]  ;;  %v3923_v28 = vld [vmem:[#allocation5 + $0x34] sm:$0xf0]  ;;  %v3070_v29 = vor.u32 %v3947_v24, %v3069_v23  ;;  %v3922_v31 = vld [vmem:[#allocation5 + $0x34] sm:$0xf] }
  0x6a   : > { %801 = vmatpush.bf16.msra.mxu1 %v3002_v11  ;;  %v3963_v30 = vld [vmem:[#allocation8 + $0xf4] sm:$0xf0]  ;;  %v3945_v35 = vld [vmem:[#allocation8 + $0x64] sm:$0xf0]  ;;  %v3125_v36 = vld [vmem:[#allocation8 + $0xe0] sm:$0xf]  ;;  %v2974_v38 = vor.u32 %v3923_v28, %v2973_v27 }
  0x6b   : > { %v2975_v32 = vld [vmem:[#allocation5 + $0x38] sm:$0xf0]  ;;  %v3134_v33 = vor.u32 %v3963_v30, %v3133_v25  ;;  %1018 = vmatpush.bf16.msra.mxu2 %v3070_v29  ;;  %v3961_v37 = vld [vmem:[#allocation8 + $0xe4] sm:$0xf0]  ;;  %v2965_v39 = vld [vmem:[#allocation5 + $0x20] sm:$0xf]  ;;  %v3062_v41 = vor.u32 %v3945_v35, %v3061_v34 }
  0x6c   : > { %v3921_v40 = vld [vmem:[#allocation5 + $0x24] sm:$0xf0]  ;;  %v3126_v42 = vor.u32 %v3961_v37, %v3125_v36  ;;  %v2978_v43 = vor.u32 %v3922_v31, %v2975_v32  ;;  %v3920_v44 = vld [vmem:[#allocation5 + $0x24] sm:$0xf]  ;;  %v3053_v45 = vld [vmem:[#allocation8 + $0x50] sm:$0xf] }
  0x6d   : > { %788 = vmatpush.bf16.msra.mxu0 %v2990_v16  ;;  %1032 = vmatpush.bf16.msra.mxu3 %v3134_v33  ;;  %v3943_v46 = vld [vmem:[#allocation8 + $0x54] sm:$0xf0]  ;;  %v2967_v47 = vld [vmem:[#allocation5 + $0x28] sm:$0xf0]  ;;  %v3117_v48 = vld [vmem:[#allocation8 + $0xd0] sm:$0xf]  ;;  %v2966_v51 = vor.u32 %v3921_v40, %v2965_v39 }
  0x6e   : > { %802 = vmatpush.bf16.msra.mxu1 %v2994_v17  ;;  %v3959_v49 = vld [vmem:[#allocation8 + $0xd4] sm:$0xf0]  ;;  %v3054_v50 = vor.u32 %v3943_v46, %v3053_v45  ;;  %v2957_v52 = vld [vmem:[#allocation5 + $0x10] sm:$0xf]  ;;  %v3045_v54 = vld [vmem:[#allocation8 + $0x40] sm:$0xf]  ;;  %v2970_v56 = vor.u32 %v3920_v44, %v2967_v47 }
  0x6f   : > { %1019 = vmatpush.bf16.msra.mxu2 %v3062_v41  ;;  %v3118_v53 = vor.u32 %v3959_v49, %v3117_v48  ;;  %v3941_v55 = vld [vmem:[#allocation8 + $0x44] sm:$0xf0]  ;;  %v3919_v57 = vld [vmem:[#allocation5 + $0x14] sm:$0xf0]  ;;  %v3109_v58 = vld [vmem:[#allocation8 + $0xc0] sm:$0xf] }
  0x70   : > { %v3957_v59 = vld [vmem:[#allocation8 + $0xc4] sm:$0xf0]  ;;  %v3918_v60 = vld [vmem:[#allocation5 + $0x14] sm:$0xf]  ;;  %v2959_v61 = vld [vmem:[#allocation5 + $0x18] sm:$0xf0]  ;;  %v3046_v0 = vor.u32 %v3941_v55, %v3045_v54  ;;  %v2958_v1 = vor.u32 %v3919_v57, %v2957_v52 }
  0x71   : > { %789 = vmatpush.bf16.msra.mxu0 %v2982_v22  ;;  %1033 = vmatpush.bf16.msra.mxu3 %v3126_v42  ;;  %v2949_v62 = vld [vmem:[#allocation5] sm:$0xf]  ;;  %v3917_v63 = vld [vmem:[#allocation5 + $0x4] sm:$0xf0]  ;;  %v3916_v2 = vld [vmem:[#allocation5 + $0x4] sm:$0xf]  ;;  %v3110_v3 = vor.u32 %v3957_v59, %v3109_v58  ;;  %v2962_v6 = vor.u32 %v3918_v60, %v2959_v61 }
  0x72   : > { %803 = vmatpush.bf16.msra.mxu1 %v2986_v26  ;;  %v3037_v4 = vld [vmem:[#allocation8 + $0x30] sm:$0xf]  ;;  %v3939_v5 = vld [vmem:[#allocation8 + $0x34] sm:$0xf0]  ;;  %v2951_v9 = vld [vmem:[#allocation5 + $0x8] sm:$0xf0]  ;;  %v2950_v15 = vor.u32 %v3917_v63, %v2949_v62 }
  0x73   : > { %1020 = vmatpush.bf16.msra.mxu2 %v3054_v50  ;;  %v3101_v7 = vld [vmem:[#allocation8 + $0xb0] sm:$0xf]  ;;  %v3955_v8 = vld [vmem:[#allocation8 + $0xb4] sm:$0xf0]  ;;  %v3946_v10 = vld [vmem:[#allocation8 + $0x74] sm:$0xf]  ;;  %v3038_v14 = vor.u32 %v3939_v5, %v3037_v4  ;;  %v2954_v17 = vor.u32 %v3916_v2, %v2951_v9 }
  0x74   : > { %v3071_v11 = vld [vmem:[#allocation8 + $0x78] sm:$0xf0]  ;;  %v3962_v12 = vld [vmem:[#allocation8 + $0xf4] sm:$0xf]  ;;  %v3102_v16 = vor.u32 %v3955_v8, %v3101_v7  ;;  %v3944_v20 = vld [vmem:[#allocation8 + $0x64] sm:$0xf] }
  0x75   : > { %790 = vmatpush.bf16.msra.mxu0 %v2974_v38  ;;  %1034 = vmatpush.bf16.msra.mxu3 %v3118_v53  ;;  %v3135_v13 = vld [vmem:[#allocation8 + $0xf8] sm:$0xf0]  ;;  %v3074_v18 = vor.u32 %v3946_v10, %v3071_v11  ;;  %v3063_v21 = vld [vmem:[#allocation8 + $0x68] sm:$0xf0]  ;;  %v3960_v23 = vld [vmem:[#allocation8 + $0xe4] sm:$0xf] }
  0x76   : > { %804 = vmatpush.bf16.msra.mxu1 %v2978_v43  ;;  %v3138_v19 = vor.u32 %v3962_v12, %v3135_v13  ;;  %v3915_v22 = vld [vmem:[%s5010_s22] sm:$0xff]  ;;  %v3066_v25 = vor.u32 %v3944_v20, %v3063_v21  ;;  %v3940_v33 = vld [vmem:[#allocation8 + $0x44] sm:$0xf]  ;;  %v3029_v45 = vld [vmem:[#allocation8 + $0x20] sm:$0xf]  ;;  %s5157_s1 = sld [smem:[#allocation34_spill]] }
  0x77   : > { %1021 = vmatpush.bf16.msra.mxu2 %v3046_v0  ;;  %v3127_v24 = vld [vmem:[#allocation8 + $0xe8] sm:$0xf0]  ;;  %v3942_v27 = vld [vmem:[#allocation8 + $0x54] sm:$0xf]  ;;  %v3055_v28 = vld [vmem:[#allocation8 + $0x58] sm:$0xf0] }
  0x78   : > { %v3130_v26 = vor.u32 %v3960_v23, %v3127_v24  ;;  %v3958_v29 = vld [vmem:[#allocation8 + $0xd4] sm:$0xf]  ;;  %v3119_v30 = vld [vmem:[#allocation8 + $0xd8] sm:$0xf0]  ;;  %v3058_v31 = vor.u32 %v3942_v27, %v3055_v28  ;;  %v3047_v34 = vld [vmem:[#allocation8 + $0x48] sm:$0xf0] }
  0x79   : > { %791 = vmatpush.bf16.msra.mxu0 %v2966_v51  ;;  %1035 = vmatpush.bf16.msra.mxu3 %v3110_v3  ;;  %v3122_v32 = vor.u32 %v3958_v29, %v3119_v30  ;;  %v3956_v35 = vld [vmem:[#allocation8 + $0xc4] sm:$0xf]  ;;  %v3111_v36 = vld [vmem:[#allocation8 + $0xc8] sm:$0xf0]  ;;  %v3050_v37 = vor.u32 %v3940_v33, %v3047_v34  ;;  %v3938_v39 = vld [vmem:[#allocation8 + $0x34] sm:$0xf] }
  0x7a   : > { %805 = vmatpush.bf16.msra.mxu1 %v2970_v56  ;;  %v3114_v38 = vor.u32 %v3956_v35, %v3111_v36  ;;  %v3039_v40 = vld [vmem:[#allocation8 + $0x38] sm:$0xf0]  ;;  %v3954_v41 = vld [vmem:[#allocation8 + $0xb4] sm:$0xf]  ;;  %v3937_v46 = vld [vmem:[#allocation8 + $0x24] sm:$0xf0] }
  0x7b   : > { %1022 = vmatpush.bf16.msra.mxu2 %v3038_v14  ;;  %v3103_v42 = vld [vmem:[#allocation8 + $0xb8] sm:$0xf0]  ;;  %v3042_v43 = vor.u32 %v3938_v39, %v3039_v40  ;;  %v3093_v47 = vld [vmem:[#allocation8 + $0xa0] sm:$0xf]  ;;  %v3030_v48 = vor.u32 %v3937_v46, %v3029_v45  ;;  %v3953_v49 = vld [vmem:[#allocation8 + $0xa4] sm:$0xf0] }
  0x7c   : > { %v3106_v44 = vor.u32 %v3954_v41, %v3103_v42  ;;  %v3936_v50 = vld [vmem:[#allocation8 + $0x24] sm:$0xf]  ;;  %v3031_v51 = vld [vmem:[#allocation8 + $0x28] sm:$0xf0]  ;;  %v3094_v52 = vor.u32 %v3953_v49, %v3093_v47  ;;  %v3021_v57 = vld [vmem:[#allocation8 + $0x10] sm:$0xf] }
  0x7d   : > { %792 = vmatpush.bf16.msra.mxu0 %v2958_v1  ;;  %1036 = vmatpush.bf16.msra.mxu3 %v3102_v16  ;;  %v3034_v53 = vor.u32 %v3936_v50, %v3031_v51  ;;  %v3952_v54 = vld [vmem:[#allocation8 + $0xa4] sm:$0xf]  ;;  %v3095_v55 = vld [vmem:[#allocation8 + $0xa8] sm:$0xf0]  ;;  %v3935_v58 = vld [vmem:[#allocation8 + $0x14] sm:$0xf0] }
  0x7e   : > { %806 = vmatpush.bf16.msra.mxu1 %v2962_v6  ;;  %v3098_v56 = vor.u32 %v3952_v54, %v3095_v55  ;;  %v3085_v59 = vld [vmem:[#allocation8 + $0x90] sm:$0xf]  ;;  %v3022_v60 = vor.u32 %v3935_v58, %v3021_v57  ;;  %v3951_v61 = vld [vmem:[#allocation8 + $0x94] sm:$0xf0]  ;;  %v3934_v62 = vld [vmem:[#allocation8 + $0x14] sm:$0xf] }
  0x7f   : > { %1023 = vmatpush.bf16.msra.mxu2 %v3030_v48  ;;  %v3023_v63 = vld [vmem:[#allocation8 + $0x18] sm:$0xf0]  ;;  %v3086_v0 = vor.u32 %v3951_v61, %v3085_v59  ;;  %v3950_v2 = vld [vmem:[#allocation8 + $0x94] sm:$0xf]  ;;  %v3013_v5 = vld [vmem:[#allocation8] sm:$0xf] }
  0x80   : > { %v3026_v1 = vor.u32 %v3934_v62, %v3023_v63  ;;  %v3087_v3 = vld [vmem:[#allocation8 + $0x98] sm:$0xf0]  ;;  %v3933_v6 = vld [vmem:[#allocation8 + $0x4] sm:$0xf0]  ;;  %v3077_v7 = vld [vmem:[#allocation8 + $0x80] sm:$0xf] }
  0x81   : > { %793 = vmatpush.bf16.msra.mxu0 %v2950_v15  ;;  %1037 = vmatpush.bf16.msra.mxu3 %v3094_v52  ;;  %v3090_v4 = vor.u32 %v3950_v2, %v3087_v3  ;;  %v3014_v8 = vor.u32 %v3933_v6, %v3013_v5  ;;  %v3949_v9 = vld [vmem:[#allocation8 + $0x84] sm:$0xf0]  ;;  %v3932_v10 = vld [vmem:[#allocation8 + $0x4] sm:$0xf]  ;;  %v3015_v11 = vld [vmem:[#allocation8 + $0x8] sm:$0xf0] }
  0x82   : > { %807 = vmatpush.bf16.msra.mxu1 %v2954_v17  ;;  %v3078_v12 = vor.u32 %v3949_v9, %v3077_v7  ;;  %v3018_v13 = vor.u32 %v3932_v10, %v3015_v11  ;;  %v3948_v14 = vld [vmem:[#allocation8 + $0x84] sm:$0xf]  ;;  %v3079_v15 = vld [vmem:[#allocation8 + $0x88] sm:$0xf0]  ;;  %v3261_v17 = vld [vmem:[#allocation10 + $0xf0] sm:$0xf] }
  0x83   : > { %1024 = vmatpush.bf16.msra.mxu2 %v3022_v60  ;;  %v3082_v16 = vor.u32 %v3948_v14, %v3079_v15  ;;  %v3263_v21 = vld [vmem:[#allocation10 + $0xf8] sm:$0xf0]  ;;  %v3993_v23 = vld [vmem:[#allocation10 + $0xe4] sm:$0xf0]  ;;  %v3197_v27 = vld [vmem:[#allocation10 + $0x70] sm:$0xf] }
  0x84   : > { %794 = vmatmul.bf16.vlgmr.msra.gmra.mxu0 %v3915_v22  ;;  %v3979_v29 = vld [vmem:[#allocation10 + $0x74] sm:$0xf0]  ;;  %v3978_v30 = vld [vmem:[#allocation10 + $0x74] sm:$0xf]  ;;  %v3245_v35 = vld [vmem:[#allocation10 + $0xd0] sm:$0xf] }
  0x85   : > { %1046 = vmatpush.bf16.msrb.mxu0 %v3074_v18  ;;  %808 = vmatmul.bf16.vlgmr.msra.gmra.mxu1 %v3915_v22  ;;  %v3995_v18 = vld [vmem:[#allocation10 + $0xf4] sm:$0xf0]  ;;  %v3253_v22 = vld [vmem:[#allocation10 + $0xe0] sm:$0xf]  ;;  %v3198_v33 = vor.u32 %v3979_v29, %v3197_v27  ;;  %v3977_v40 = vld [vmem:[#allocation10 + $0x64] sm:$0xf0] }
  0x86   : > { %1060 = vmatpush.bf16.msrb.mxu1 %v3138_v19  ;;  %1038 = vmatpush.bf16.msra.mxu3 %v3086_v0  ;;  %v3994_v19 = vld [vmem:[#allocation10 + $0xf4] sm:$0xf]  ;;  %v3262_v20 = vor.u32 %v3995_v18, %v3261_v17  ;;  %v3254_v28 = vor.u32 %v3993_v23, %v3253_v22  ;;  %v3991_v36 = vld [vmem:[#allocation10 + $0xd4] sm:$0xf0]  ;;  %v3189_v39 = vld [vmem:[#allocation10 + $0x60] sm:$0xf] }
  0x87   : > { %1025 = vmatpush.bf16.msra.mxu2 %v3014_v8  ;;  %v3266_v24 = vor.u32 %v3994_v19, %v3263_v21  ;;  %v3190_v41 = vor.u32 %v3977_v40, %v3189_v39  ;;  %v3976_v42 = vld [vmem:[#allocation10 + $0x64] sm:$0xf]  ;;  %v3237_v47 = vld [vmem:[#allocation10 + $0xc0] sm:$0xf]  ;;  %v3989_v48 = vld [vmem:[#allocation10 + $0xc4] sm:$0xf0] }
  0x88   : > { %v3988_v49 = vld [vmem:[#allocation10 + $0xc4] sm:$0xf]  ;;  %v3239_v50 = vld [vmem:[#allocation10 + $0xc8] sm:$0xf0]  ;;  %v3238_v51 = vor.u32 %v3989_v48, %v3237_v47  ;;  %v694_v55 = vld [vmem:[#allocation7] sm:$0x3] }
  0x89   : > { %1047 = vmatpush.bf16.msrb.mxu0 %v3066_v25  ;;  %v3992_v25 = vld [vmem:[#allocation10 + $0xe4] sm:$0xf]  ;;  %v3242_v52 = vor.u32 %v3988_v49, %v3239_v50  ;;  %v697_v57 = vperm.slane %v694_v55, 1  ;;  %v3181_v2 = vld [vmem:[#allocation10 + $0x50] sm:$0xf]  ;;  %s5158_s15 = sld [smem:[#allocation35_spill]] }
  0x8a   : > { %1061 = vmatpush.bf16.msrb.mxu1 %v3130_v26  ;;  %1039 = vmatpush.bf16.msra.mxu3 %v3078_v12  ;;  %v3255_v26 = vld [vmem:[#allocation10 + $0xe8] sm:$0xf0]  ;;  %v3975_v3 = vld [vmem:[#allocation10 + $0x54] sm:$0xf0]  ;;  %v3183_v6 = vld [vmem:[#allocation10 + $0x58] sm:$0xf0] }
  0x8b   : > { %1278 = vmatpush.bf16.msrb.mxu2 %v3198_v33  ;;  %v3182_v5 = vor.u32 %v3975_v3, %v3181_v2  ;;  %v3229_v8 = vld [vmem:[#allocation10 + $0xb0] sm:$0xf]  ;;  %v3987_v9 = vld [vmem:[#allocation10 + $0xb4] sm:$0xf0]  ;;  %v3986_v10 = vld [vmem:[#allocation10 + $0xb4] sm:$0xf] }
  0x8c   : > { %v3230_v11 = vor.u32 %v3987_v9, %v3229_v8  ;;  %v3231_v12 = vld [vmem:[#allocation10 + $0xb8] sm:$0xf0]  ;;  %v3173_v14 = vld [vmem:[#allocation10 + $0x40] sm:$0xf]  ;;  %v3973_v15 = vld [vmem:[#allocation10 + $0x44] sm:$0xf0] }
  0x8d   : > { %1048 = vmatpush.bf16.msrb.mxu0 %v3058_v31  ;;  %v3199_v31 = vld [vmem:[#allocation10 + $0x78] sm:$0xf0]  ;;  %v3174_v17 = vor.u32 %v3973_v15, %v3173_v14  ;;  %v3175_v18 = vld [vmem:[#allocation10 + $0x48] sm:$0xf0]  ;;  %v3985_v21 = vld [vmem:[#allocation10 + $0xa4] sm:$0xf0] }
  0x8e   : > { %1062 = vmatpush.bf16.msrb.mxu1 %v3122_v32  ;;  %1292 = vmatpush.bf16.msrb.mxu3 %v3262_v20  ;;  %v3258_v32 = vor.u32 %v3992_v25, %v3255_v26  ;;  %v3202_v34 = vor.u32 %v3978_v30, %v3199_v31  ;;  %v3221_v20 = vld [vmem:[#allocation10 + $0xa0] sm:$0xf]  ;;  %v3984_v22 = vld [vmem:[#allocation10 + $0xa4] sm:$0xf]  ;;  %v3165_v26 = vld [vmem:[#allocation10 + $0x30] sm:$0xf] }
  0x8f   : > { %1279 = vmatpush.bf16.msrb.mxu2 %v3190_v41  ;;  %v3222_v23 = vor.u32 %v3985_v21, %v3221_v20  ;;  %v3971_v27 = vld [vmem:[#allocation10 + $0x34] sm:$0xf0]  ;;  %v3167_v30 = vld [vmem:[#allocation10 + $0x38] sm:$0xf0]  ;;  %v3969_v39 = vld [vmem:[#allocation10 + $0x24] sm:$0xf0] }
  0x90   : > { %v3166_v29 = vor.u32 %v3971_v27, %v3165_v26  ;;  %v3983_v33 = vld [vmem:[#allocation10 + $0x94] sm:$0xf0]  ;;  %v3968_v40 = vld [vmem:[#allocation10 + $0x24] sm:$0xf]  ;;  %v3207_v48 = vld [vmem:[#allocation10 + $0x88] sm:$0xf0] }
  0x91   : > { %1049 = vmatpush.bf16.msrb.mxu0 %v3050_v37  ;;  %v3990_v37 = vld [vmem:[#allocation10 + $0xd4] sm:$0xf]  ;;  %v3149_v50 = vld [vmem:[#allocation10 + $0x10] sm:$0xf]  ;;  %v4027_v3 = vld [vmem:[#allocation13 + $0xf4] sm:$0xf0] }
  0x92   : > { %1063 = vmatpush.bf16.msrb.mxu1 %v3114_v38  ;;  %v3247_v38 = vld [vmem:[#allocation10 + $0xd8] sm:$0xf0]  ;;  %1293 = vmatpush.bf16.msrb.mxu3 %v3254_v28  ;;  %v3970_v28 = vld [vmem:[#allocation10 + $0x34] sm:$0xf]  ;;  %v4025_v8 = vld [vmem:[#allocation13 + $0xe4] sm:$0xf0] }
  0x93   : > { %v3250_v46 = vor.u32 %v3990_v37, %v3247_v38  ;;  %1280 = vmatpush.bf16.msrb.mxu2 %v3182_v5  ;;  %v3170_v31 = vor.u32 %v3970_v28, %v3167_v30  ;;  %v3157_v38 = vld [vmem:[#allocation10 + $0x20] sm:$0xf]  ;;  %v3389_v2 = vld [vmem:[#allocation13 + $0xf0] sm:$0xf]  ;;  %v4011_v14 = vld [vmem:[#allocation13 + $0x74] sm:$0xf0] }
  0x94   : > { %v3158_v41 = vor.u32 %v3969_v39, %v3157_v38  ;;  %v3390_v5 = vor.u32 %v4027_v3, %v3389_v2  ;;  %v4010_v15 = vld [vmem:[#allocation13 + $0x74] sm:$0xf]  ;;  %v852_v20 = vld [vmem:[%s5111_s4] sm:$0x3]  ;;  %v3309_v3 = vld [vmem:[#allocation13 + $0x50] sm:$0xf] }
  0x95   : > { %1050 = vmatpush.bf16.msrb.mxu0 %v3042_v43  ;;  %v3191_v43 = vld [vmem:[#allocation10 + $0x68] sm:$0xf0]  ;;  %v854_v26 = vperm.slane %v852_v20, 0  ;;  %s5159_s6 = sld [smem:[#allocation36_spill]]  ;;  %s2942_s3 = sshll.u32 %s5006_s10, 4 }
  0x96   : > { %1064 = vmatpush.bf16.msrb.mxu1 %v3106_v44  ;;  %v3246_v44 = vor.u32 %v3991_v36, %v3245_v35  ;;  %v3194_v45 = vor.u32 %v3976_v42, %v3191_v43  ;;  %v3215_v36 = vld [vmem:[#allocation10 + $0x98] sm:$0xf0]  ;;  %v3159_v42 = vld [vmem:[#allocation10 + $0x28] sm:$0xf0]  ;;  %s4156_s5 = sshll.u32 %s4861_s25, 4  ;;  %s5160_s2 = sld [smem:[#allocation37_spill]] }
  0x97   : > { %1281 = vmatpush.bf16.msrb.mxu2 %v3174_v17  ;;  %v3162_v43 = vor.u32 %v3968_v40, %v3159_v42  ;;  %s673_s30 = scalar_lea.vmem [#allocation20], %s2942_s3 }
  0x98   : > { %1294 = vmatpush.bf16.msrb.mxu3 %v3246_v44  ;;  %v3205_v44 = vld [vmem:[#allocation10 + $0x80] sm:$0xf]  ;;  %s2743_s25 = sshll.u32 %s673_s30, 4  ;;  %s2744_s25 = int_to_ptr.vmem [resolvable:$true] %s2743_s25 }
  0x99   : > { %1051 = vmatpush.bf16.msrb.mxu0 %v3034_v53 }
  0x9a   : > { %1065 = vmatpush.bf16.msrb.mxu1 %v3098_v56  ;;  %v696_v56 = vperm.slane %v694_v55, 0 }
  0x9b   : > { %1282 = vmatpush.bf16.msrb.mxu2 %v3166_v29 }
  0x9c   : > { %1295 = vmatpush.bf16.msrb.mxu3 %v3238_v51  ;;  %v3967_v51 = vld [vmem:[#allocation10 + $0x14] sm:$0xf0]  ;;  %s2742_s26 = scalar_lea.hbm %s5160_s2, %s4156_s5  ;;  %s4671_s17 = scalar_lea.hbm %s5160_s2, 32 }
  0x9d   : > { %1052 = vmatpush.bf16.msrb.mxu0 %v3026_v1  ;;  %s2745_s14 = sshll.u32 %s2742_s26, 4  ;;  %s2746_s14 = int_to_ptr.hbm [resolvable:$true] %s2745_s14 }
  0x9e   : > { %1066 = vmatpush.bf16.msrb.mxu1 %v3090_v4  ;;  %v3974_v4 = vld [vmem:[#allocation10 + $0x54] sm:$0xf]  ;;  %s4665_s27 = sshra.s32 %s2746_s14, 4  ;;  %s4666_s27 = int_to_ptr.hbm [resolvable:$true] %s4665_s27 }
  0x9f   : > { %v3186_v7 = vor.u32 %v3974_v4, %v3183_v6  ;;  %1283 = vmatpush.bf16.msrb.mxu2 %v3158_v41  ;;  %v4026_v4 = vld [vmem:[#allocation13 + $0xf4] sm:$0xf]  ;;  %v3391_v6 = vld [vmem:[#allocation13 + $0xf8] sm:$0xf0]  ;;  %s4667_s24 = scalar_lea.hbm %s4666_s27, 16  ;;  %p4672_p12 = scmp.lt.s32.totalorder %s4666_s27, %s5160_s2 }
  0xa0   : > { %1296 = vmatpush.bf16.msrb.mxu3 %v3230_v11  ;;  %v3394_v9 = vor.u32 %v4026_v4, %v3391_v6  ;;  %v3383_v11 = vld [vmem:[#allocation13 + $0xe8] sm:$0xf0]  ;;  %v4007_v4 = vld [vmem:[#allocation13 + $0x54] sm:$0xf0]  ;;  %p4668_p1 = scmp.ne.s32.totalorder %s4666_s27, %s4667_s24  ;;  %p4673_p7 = scmp.lt.s32.totalorder %s4671_s17, %s4667_s24 }
  0xa1   : > { %1053 = vmatpush.bf16.msrb.mxu0 %v3018_v13  ;;  %v3234_v13 = vor.u32 %v3986_v10, %v3231_v12  ;;  %v4024_v10 = vld [vmem:[#allocation13 + $0xe4] sm:$0xf]  ;;  %v3325_v12 = vld [vmem:[#allocation13 + $0x70] sm:$0xf]  ;;  %v3310_v6 = vor.u32 %v4007_v4, %v3309_v3  ;;  %v4059_v4 = vld [vmem:[#allocation16 + $0xf4] sm:$0xf0] }
  0xa2   : > { %1067 = vmatpush.bf16.msrb.mxu1 %v3082_v16  ;;  %v3972_v16 = vld [vmem:[#allocation10 + $0x44] sm:$0xf]  ;;  %v3386_v17 = vor.u32 %v4024_v10, %v3383_v11  ;;  %v4019_v10 = vld [vmem:[#allocation13 + $0xb4] sm:$0xf0]  ;;  %v3517_v3 = vld [vmem:[#allocation16 + $0xf0] sm:$0xf]  ;;  %p4669_p3 = pnand %p4668_p1, %p4972_p4  ;;  %p4674_p8 = por %p4673_p7, %p4672_p12 }
  0xa3   : > { %v3178_v19 = vor.u32 %v3972_v16, %v3175_v18  ;;  %v3327_v16 = vld [vmem:[#allocation13 + $0x78] sm:$0xf0]  ;;  %v3326_v18 = vor.u32 %v4011_v14, %v3325_v12  ;;  %v4018_v12 = vld [vmem:[#allocation13 + $0xb4] sm:$0xf] }
  0xa4   : > { %1297 = vmatpush.bf16.msrb.mxu3 %v3222_v23  ;;  %p4670_p5 = pneg %p4669_p3 }
  0xa5   : > { %1306 = vmatpush.bf16.msra.mxu0 %v3202_v34  ;;  %v3982_v34 = vld [vmem:[#allocation10 + $0x94] sm:$0xf] }
  0xa6   : > { %1320 = vmatpush.bf16.msra.mxu1 %v3266_v24  ;;  %v3223_v24 = vld [vmem:[#allocation10 + $0xa8] sm:$0xf0]  ;;  %v3218_v37 = vor.u32 %v3982_v34, %v3215_v36  ;;  %p4675_p9 = pnand %p4674_p8, %p4670_p5 }
  0xa7   : > { %v3226_v25 = vor.u32 %v3984_v22, %v3223_v24  ;;  %v855_v22 = vperm.slane %v852_v20, 1 }
  0xa9   : > { %1307 = vmatpush.bf16.msra.mxu0 %v3194_v45  ;;  %v3981_v45 = vld [vmem:[#allocation10 + $0x84] sm:$0xf0] }
  0xaa   : > { %1321 = vmatpush.bf16.msra.mxu1 %v3258_v32  ;;  %v3213_v32 = vld [vmem:[#allocation10 + $0x90] sm:$0xf]  ;;  %v3206_v47 = vor.u32 %v3981_v45, %v3205_v44 }
  0xab   : > { %v3214_v35 = vor.u32 %v3983_v33, %v3213_v32  ;;  %v3373_v45 = vld [vmem:[#allocation13 + $0xd0] sm:$0xf] }
  0xad   : > { %1308 = vmatpush.bf16.msra.mxu0 %v3186_v7  ;;  %1298 = vmatpush.bf16.msrb.mxu3 %v3214_v35  ;;  %v3381_v7 = vld [vmem:[#allocation13 + $0xe0] sm:$0xf] }
  0xae   : > { %1322 = vmatpush.bf16.msra.mxu1 %v3250_v46  ;;  %v3980_v46 = vld [vmem:[#allocation10 + $0x84] sm:$0xf] }
  0xaf   : > { %v3210_v49 = vor.u32 %v3980_v46, %v3207_v48  ;;  %v4023_v46 = vld [vmem:[#allocation13 + $0xd4] sm:$0xf0] }
  0xb0   : > { %v3374_v48 = vor.u32 %v4023_v46, %v3373_v45  ;;  %v3333_v45 = vld [vmem:[#allocation13 + $0x80] sm:$0xf]  ;;  %v4013_v46 = vld [vmem:[#allocation13 + $0x84] sm:$0xf0] }
  0xb1   : > { %1309 = vmatpush.bf16.msra.mxu0 %v3178_v19  ;;  %1299 = vmatpush.bf16.msrb.mxu3 %v3206_v47  ;;  %v3330_v19 = vor.u32 %v4010_v15, %v3327_v16  ;;  %v4022_v47 = vld [vmem:[#allocation13 + $0xd4] sm:$0xf]  ;;  %v3301_v15 = vld [vmem:[#allocation13 + $0x40] sm:$0xf]  ;;  %v4005_v16 = vld [vmem:[#allocation13 + $0x44] sm:$0xf0] }
  0xb2   : > { %1323 = vmatpush.bf16.msra.mxu1 %v3242_v52  ;;  %v3966_v52 = vld [vmem:[#allocation10 + $0x14] sm:$0xf] }
  0xb5   : > { %1310 = vmatpush.bf16.msra.mxu0 %v3170_v31 }
  0xb6   : > { %1324 = vmatpush.bf16.msra.mxu1 %v3234_v13  ;;  %v3382_v13 = vor.u32 %v4025_v8, %v3381_v7  ;;  %v3311_v7 = vld [vmem:[#allocation13 + $0x58] sm:$0xf0] }
  0xb9   : > { %1311 = vmatpush.bf16.msra.mxu0 %v3162_v43 }
  0xba   : > { %1325 = vmatpush.bf16.msra.mxu1 %v3226_v25 }
  0xbe   : > { %1326 = vmatpush.bf16.msra.mxu1 %v3218_v37 }
  0xc2   : > { %1327 = vmatpush.bf16.msra.mxu1 %v3210_v49  ;;  %v3375_v49 = vld [vmem:[#allocation13 + $0xd8] sm:$0xf0] }
 0x101   : > { %v795_v53 = vpop.f32.mrf.mxu0 }
 0x102   : > { %v809_v54 = vpop.f32.mrf.mxu1  ;;  %v5037_v59 = vadd.f32 %v795_v53, %v696_v56  ;;  %v3150_v53 = vor.u32 %v3967_v51, %v3149_v50  ;;  %v3378_v50 = vor.u32 %v4022_v47, %v3375_v49  ;;  %v3317_v51 = vld [vmem:[#allocation13 + $0x60] sm:$0xf]  ;;  %v4012_v47 = vld [vmem:[#allocation13 + $0x84] sm:$0xf]  ;;  %v3335_v49 = vld [vmem:[#allocation13 + $0x88] sm:$0xf0] }
 0x103   : > { %v5041_v62 = vadd.f32 %v809_v54, %v697_v57  ;;  %v3151_v54 = vld [vmem:[#allocation10 + $0x18] sm:$0xf0] }
 0x104   : > { %v3154_v55 = vor.u32 %v3966_v52, %v3151_v54  ;;  %1284 = vmatpush.bf16.msrb.mxu2 %v3150_v53  ;;  %v4009_v52 = vld [vmem:[#allocation13 + $0x64] sm:$0xf0]  ;;  %v4008_v53 = vld [vmem:[#allocation13 + $0x64] sm:$0xf] }
 0x105   : > { %v3318_v54 = vor.u32 %v4009_v52, %v3317_v51  ;;  %v3277_v51 = vld [vmem:[#allocation13 + $0x10] sm:$0xf]  ;;  %v3999_v52 = vld [vmem:[#allocation13 + $0x14] sm:$0xf0] }
 0x106   : > { %1312 = vmatpush.bf16.msra.mxu0 %v3154_v55  ;;  %v3319_v55 = vld [vmem:[#allocation13 + $0x68] sm:$0xf0] }
 0x109   : > { %v797_v58 = vpop.f32.mrf.mxu0 }
 0x10a   : > { %v5039_v60 = vadd.f32 %v797_v58, %v696_v56  ;;  %v811_v61 = vpop.f32.mrf.mxu1  ;;  %v3141_v56 = vld [vmem:[#allocation10] sm:$0xf]  ;;  %v3964_v58 = vld [vmem:[#allocation10 + $0x4] sm:$0xf] }
 0x10b   : > { %v5043_v63 = vadd.f32 %v811_v61, %v697_v57  ;;  %v3965_v57 = vld [vmem:[#allocation10 + $0x4] sm:$0xf0] }
 0x10c   : > { %v818_v0 = vpack.c.bf16 %v5039_v60, %v5037_v59  ;;  %v3142_v61 = vor.u32 %v3965_v57, %v3141_v56  ;;  %v3365_v56 = vld [vmem:[#allocation13 + $0xc0] sm:$0xf]  ;;  %v4021_v57 = vld [vmem:[#allocation13 + $0xc4] sm:$0xf0] }
 0x10d   : > { %v819_v1 = vpack.c.bf16 %v5043_v63, %v5041_v62 }
 0x10e   : > { %1026 = vmatmul.bf16.vlgmr.msra.gmra.mxu2 %v818_v0  ;;  %1054 = vmatmul.bf16.vlgmr.msrb.gmra.mxu0 %v818_v0  ;;  %v3143_v0 = vld [vmem:[#allocation10 + $0x8] sm:$0xf0] }
 0x10f   : > { %1040 = vmatmul.bf16.vlgmr.msra.gmra.mxu3 %v819_v1  ;;  %1068 = vmatmul.bf16.vlgmr.msrb.gmra.mxu1 %v819_v1  ;;  %v3146_v1 = vor.u32 %v3964_v58, %v3143_v0  ;;  %v3322_v58 = vor.u32 %v4008_v53, %v3319_v55  ;;  %v4020_v0 = vld [vmem:[#allocation13 + $0xc4] sm:$0xf]  ;;  %v3998_v53 = vld [vmem:[#allocation13 + $0x14] sm:$0xf]  ;;  %v3279_v55 = vld [vmem:[#allocation13 + $0x18] sm:$0xf0] }
 0x110   : > { %1285 = vmatpush.bf16.msrb.mxu2 %v3142_v61  ;;  %1552 = vmatpush.bf16.msra.mxu3 %v3390_v5  ;;  %v3366_v61 = vor.u32 %v4021_v57, %v3365_v56  ;;  %v4006_v5 = vld [vmem:[#allocation13 + $0x54] sm:$0xf]  ;;  %v3282_v56 = vor.u32 %v3998_v53, %v3279_v55  ;;  %v3269_v57 = vld [vmem:[#allocation13] sm:$0xf]  ;;  %v4040_v55 = vld [vmem:[#allocation16 + $0x64] sm:$0xf] }
 0x111   : > { %1313 = vmatpush.bf16.msra.mxu0 %v3146_v1  ;;  %1580 = vmatpush.bf16.msrb.mxu1 %v3394_v9  ;;  %v3367_v1 = vld [vmem:[#allocation13 + $0xc8] sm:$0xf0]  ;;  %v3314_v8 = vor.u32 %v4006_v5, %v3311_v7  ;;  %v3357_v9 = vld [vmem:[#allocation13 + $0xb0] sm:$0xf]  ;;  %v4058_v5 = vld [vmem:[#allocation16 + $0xf4] sm:$0xf] }
 0x112   : > { %v3370_v2 = vor.u32 %v4020_v0, %v3367_v1  ;;  %v3358_v11 = vor.u32 %v4019_v10, %v3357_v9  ;;  %v3271_v1 = vld [vmem:[#allocation13 + $0x8] sm:$0xf0]  ;;  %v3519_v7 = vld [vmem:[#allocation16 + $0xf8] sm:$0xf0] }
 0x113   : > { %v4057_v9 = vld [vmem:[#allocation16 + $0xe4] sm:$0xf0]  ;;  %v3522_v10 = vor.u32 %v4058_v5, %v3519_v7  ;;  %v4039_v5 = vld [vmem:[#allocation16 + $0x54] sm:$0xf0]  ;;  %v4038_v7 = vld [vmem:[#allocation16 + $0x54] sm:$0xf] }
 0x114   : > { %1538 = vmatpush.bf16.msra.mxu2 %v3326_v18  ;;  %1553 = vmatpush.bf16.msra.mxu3 %v3382_v13  ;;  %v3359_v13 = vld [vmem:[#allocation13 + $0xb8] sm:$0xf0]  ;;  %v3302_v18 = vor.u32 %v4005_v16, %v3301_v15 }
 0x115   : > { %1566 = vmatpush.bf16.msrb.mxu0 %v3330_v19  ;;  %1581 = vmatpush.bf16.msrb.mxu1 %v3386_v17  ;;  %v3362_v14 = vor.u32 %v4018_v12, %v3359_v13  ;;  %v4004_v17 = vld [vmem:[#allocation13 + $0x44] sm:$0xf]  ;;  %v3303_v19 = vld [vmem:[#allocation13 + $0x48] sm:$0xf0]  ;;  %v1112_v15 = vld [vmem:[#allocation11] sm:$0x3] }
 0x116   : > { %v3306_v20 = vor.u32 %v4004_v17, %v3303_v19  ;;  %v3511_v12 = vld [vmem:[#allocation16 + $0xe8] sm:$0xf0] }
 0x118   : > { %1554 = vmatpush.bf16.msra.mxu3 %v3374_v48  ;;  %1539 = vmatpush.bf16.msra.mxu2 %v3318_v54  ;;  %v3334_v48 = vor.u32 %v4013_v46, %v3333_v45  ;;  %v3278_v54 = vor.u32 %v3999_v52, %v3277_v51  ;;  %v3501_v46 = vld [vmem:[#allocation16 + $0xd0] sm:$0xf]  ;;  %v3445_v51 = vld [vmem:[#allocation16 + $0x60] sm:$0xf]  ;;  %v4041_v52 = vld [vmem:[#allocation16 + $0x64] sm:$0xf0] }
 0x119   : > { %1582 = vmatpush.bf16.msrb.mxu1 %v3378_v50  ;;  %1567 = vmatpush.bf16.msrb.mxu0 %v3322_v58  ;;  %v3338_v50 = vor.u32 %v4012_v47, %v3335_v49  ;;  %v3997_v58 = vld [vmem:[#allocation13 + $0x4] sm:$0xf0]  ;;  %v4055_v47 = vld [vmem:[#allocation16 + $0xd4] sm:$0xf0] }
 0x11a   : > { %v3270_v0 = vor.u32 %v3997_v58, %v3269_v57  ;;  %v3502_v49 = vor.u32 %v4055_v47, %v3501_v46  ;;  %v3493_v58 = vld [vmem:[#allocation16 + $0xc0] sm:$0xf]  ;;  %v4045_v47 = vld [vmem:[#allocation16 + $0x84] sm:$0xf0] }
 0x11b   : > { %v3461_v46 = vld [vmem:[#allocation16 + $0x80] sm:$0xf] }
 0x11c   : > { %1555 = vmatpush.bf16.msra.mxu3 %v3366_v61  ;;  %1540 = vmatpush.bf16.msra.mxu2 %v3310_v6  ;;  %v3996_v61 = vld [vmem:[#allocation13 + $0x4] sm:$0xf]  ;;  %v3518_v6 = vor.u32 %v4059_v4, %v3517_v3  ;;  %v3437_v4 = vld [vmem:[#allocation16 + $0x50] sm:$0xf] }
 0x11d   : > { %1583 = vmatpush.bf16.msrb.mxu1 %v3370_v2  ;;  %1568 = vmatpush.bf16.msrb.mxu0 %v3314_v8  ;;  %v3274_v2 = vor.u32 %v3996_v61, %v3271_v1  ;;  %v3509_v8 = vld [vmem:[#allocation16 + $0xe0] sm:$0xf]  ;;  %v4053_v61 = vld [vmem:[#allocation16 + $0xc4] sm:$0xf0] }
 0x11e   : > { %v3510_v13 = vor.u32 %v4057_v9, %v3509_v8  ;;  %v3494_v1 = vor.u32 %v4053_v61, %v3493_v58  ;;  %v3439_v8 = vld [vmem:[#allocation16 + $0x58] sm:$0xf0]  ;;  %v3397_v58 = vld [vmem:[#allocation16] sm:$0xf]  ;;  %v4029_v61 = vld [vmem:[#allocation16 + $0x4] sm:$0xf0] }
 0x11f   : > { %v3442_v9 = vor.u32 %v4038_v7, %v3439_v8  ;;  %v5052_v7 = vld [vmem:[#allocation14] sm:$0x3] }
 0x120   : > { %1556 = vmatpush.bf16.msra.mxu3 %v3358_v11  ;;  %1541 = vmatpush.bf16.msra.mxu2 %v3302_v18  ;;  %v4056_v11 = vld [vmem:[#allocation16 + $0xe4] sm:$0xf]  ;;  %v1115_v18 = vperm.slane %v1112_v15, 1 }
 0x121   : > { %1584 = vmatpush.bf16.msrb.mxu1 %v3362_v14  ;;  %1569 = vmatpush.bf16.msrb.mxu0 %v3306_v20  ;;  %v3514_v14 = vor.u32 %v4056_v11, %v3511_v12  ;;  %v4051_v11 = vld [vmem:[#allocation16 + $0xb4] sm:$0xf0]  ;;  %v4050_v12 = vld [vmem:[#allocation16 + $0xb4] sm:$0xf] }
 0x18b   : > { %v1055_v21 = vpop.f32.mrf.mxu0 }
 0x18c   : > { %v1069_v23 = vpop.f32.mrf.mxu1  ;;  %v1056_v24 = vadd.f32 %v1055_v21, %v855_v22  ;;  %v3349_v21 = vld [vmem:[#allocation13 + $0xa0] sm:$0xf] }
 0x18e   : > { %v1070_v29 = vadd.f32 %v1069_v23, %v1056_v24  ;;  %v4016_v23 = vld [vmem:[#allocation13 + $0xa4] sm:$0xf] }
 0x190   : > { %v1075_v34 = vmax.f32 %v1070_v29, 0.0  ;;  %v4002_v29 = vld [vmem:[#allocation13 + $0x34] sm:$0xf] }
 0x191   : > { %v1027_v25 = vpop.f32.mrf.mxu2 }
 0x192   : > { %v1041_v27 = vpop.f32.mrf.mxu3  ;;  %v1028_v32 = vadd.f32 %v1027_v25, %v854_v26  ;;  %v3351_v25 = vld [vmem:[#allocation13 + $0xa8] sm:$0xf0] }
 0x193   : > { %v1057_v28 = vpop.f32.mrf.mxu0 }
 0x194   : > { %v1058_v30 = vadd.f32 %v1057_v28, %v855_v22  ;;  %v1071_v31 = vpop.f32.mrf.mxu1  ;;  %v1042_v37 = vadd.f32 %v1041_v27, %v1028_v32  ;;  %v4017_v22 = vld [vmem:[#allocation13 + $0xa4] sm:$0xf0]  ;;  %v3293_v27 = vld [vmem:[#allocation13 + $0x30] sm:$0xf]  ;;  %v4003_v28 = vld [vmem:[#allocation13 + $0x34] sm:$0xf0] }
 0x195   : > { %v3350_v24 = vor.u32 %v4017_v22, %v3349_v21  ;;  %v1114_v22 = vperm.slane %v1112_v15, 0 }
 0x196   : > { %v1072_v33 = vadd.f32 %v1071_v31, %v1058_v30  ;;  %v1074_v42 = vmax.f32 %v1042_v37, 0.0  ;;  %v3294_v30 = vor.u32 %v4003_v28, %v3293_v27  ;;  %v3295_v31 = vld [vmem:[#allocation13 + $0x38] sm:$0xf0] }
 0x197   : > { %1557 = vmatpush.bf16.msra.mxu3 %v3350_v24  ;;  %v3298_v32 = vor.u32 %v4002_v29, %v3295_v31  ;;  %v3343_v37 = vld [vmem:[#allocation13 + $0x98] sm:$0xf0] }
 0x198   : > { %v1077_v35 = vmax.f32 %v1072_v33, 0.0  ;;  %v3341_v33 = vld [vmem:[#allocation13 + $0x90] sm:$0xf]  ;;  %1542 = vmatpush.bf16.msra.mxu2 %v3294_v30 }
 0x199   : > { %v1029_v36 = vpop.f32.mrf.mxu2  ;;  %1570 = vmatpush.bf16.msrb.mxu0 %v3298_v32 }
 0x19a   : > { %v1079_v38 = vpack.c.bf16 %v1077_v35, %v1075_v34  ;;  %v1030_v39 = vadd.f32 %v1029_v36, %v854_v26  ;;  %v1043_v40 = vpop.f32.mrf.mxu3  ;;  %v3354_v26 = vor.u32 %v4016_v23, %v3351_v25  ;;  %v4015_v34 = vld [vmem:[#allocation13 + $0x94] sm:$0xf0]  ;;  %v4014_v35 = vld [vmem:[#allocation13 + $0x94] sm:$0xf] }
 0x19b   : > { %v3342_v36 = vor.u32 %v4015_v34, %v3341_v33 }
 0x19c   : > { %v1044_v41 = vadd.f32 %v1043_v40, %v1030_v39  ;;  %1300 = vmatmul.bf16.vlgmr.msrb.gmra.mxu3 %v1079_v38  ;;  %1328 = vmatmul.bf16.vlgmr.msra.gmra.mxu1 %v1079_v38  ;;  %v3346_v38 = vor.u32 %v4014_v35, %v3343_v37  ;;  %v3285_v39 = vld [vmem:[#allocation13 + $0x20] sm:$0xf]  ;;  %v4001_v40 = vld [vmem:[#allocation13 + $0x24] sm:$0xf0] }
 0x19d   : > { %1585 = vmatpush.bf16.msrb.mxu1 %v3354_v26  ;;  %1558 = vmatpush.bf16.msra.mxu3 %v3342_v36 }
 0x19e   : > { %v1076_v43 = vmax.f32 %v1044_v41, 0.0  ;;  %v4000_v41 = vld [vmem:[#allocation13 + $0x24] sm:$0xf] }
 0x1a0   : > { %v1078_v44 = vpack.c.bf16 %v1076_v43, %v1074_v42  ;;  %v3286_v42 = vor.u32 %v4001_v40, %v3285_v39  ;;  %v3287_v43 = vld [vmem:[#allocation13 + $0x28] sm:$0xf0]  ;;  %v3453_v40 = vld [vmem:[#allocation16 + $0x70] sm:$0xf] }
 0x1a1   : > { %1586 = vmatpush.bf16.msrb.mxu1 %v3346_v38  ;;  %1559 = vmatpush.bf16.msra.mxu3 %v3334_v48  ;;  %v4054_v48 = vld [vmem:[#allocation16 + $0xd4] sm:$0xf] }
 0x1a2   : > { %1286 = vmatmul.bf16.vlgmr.msrb.gmra.mxu2 %v1078_v44  ;;  %1314 = vmatmul.bf16.vlgmr.msra.gmra.mxu0 %v1078_v44  ;;  %v3290_v44 = vor.u32 %v4000_v41, %v3287_v43  ;;  %v4043_v41 = vld [vmem:[#allocation16 + $0x74] sm:$0xf0] }
 0x1a3   : > { %1543 = vmatpush.bf16.msra.mxu2 %v3286_v42  ;;  %v4042_v42 = vld [vmem:[#allocation16 + $0x74] sm:$0xf]  ;;  %v3454_v43 = vor.u32 %v4043_v41, %v3453_v40  ;;  %v3413_v40 = vld [vmem:[#allocation16 + $0x20] sm:$0xf]  ;;  %v4033_v41 = vld [vmem:[#allocation16 + $0x24] sm:$0xf0] }
 0x1a4   : > { %1571 = vmatpush.bf16.msrb.mxu0 %v3290_v44  ;;  %v3455_v44 = vld [vmem:[#allocation16 + $0x78] sm:$0xf0] }
 0x1a5   : > { %1587 = vmatpush.bf16.msrb.mxu1 %v3338_v50  ;;  %1816 = vmatpush.bf16.msrb.mxu3 %v3518_v6  ;;  %v3458_v45 = vor.u32 %v4042_v42, %v3455_v44  ;;  %v3503_v50 = vld [vmem:[#allocation16 + $0xd8] sm:$0xf0]  ;;  %v3438_v6 = vor.u32 %v4039_v5, %v3437_v4  ;;  %v4032_v42 = vld [vmem:[#allocation16 + $0x24] sm:$0xf]  ;;  %v3415_v44 = vld [vmem:[#allocation16 + $0x28] sm:$0xf0] }
 0x1a6   : > { %v3506_v53 = vor.u32 %v4054_v48, %v3503_v50  ;;  %v4044_v48 = vld [vmem:[#allocation16 + $0x84] sm:$0xf]  ;;  %v3463_v50 = vld [vmem:[#allocation16 + $0x88] sm:$0xf0]  ;;  %v3765_v4 = vld [vmem:[#allocation17 + $0x1e0] sm:$0xf] }
 0x1a7   : > { %1544 = vmatpush.bf16.msra.mxu2 %v3278_v54  ;;  %v3446_v54 = vor.u32 %v4041_v52, %v3445_v51  ;;  %v3466_v51 = vor.u32 %v4044_v48, %v3463_v50  ;;  %v3405_v52 = vld [vmem:[#allocation16 + $0x10] sm:$0xf] }
 0x1a8   : > { %1572 = vmatpush.bf16.msrb.mxu0 %v3282_v56  ;;  %v3447_v56 = vld [vmem:[#allocation16 + $0x68] sm:$0xf0]  ;;  %v4122_v5 = vld [vmem:[#allocation17 + $0x1ec] sm:$0xf0] }
 0x1a9   : > { %1844 = vmatpush.bf16.msra.mxu1 %v3522_v10  ;;  %1817 = vmatpush.bf16.msrb.mxu3 %v3510_v13  ;;  %v3450_v57 = vor.u32 %v4040_v55, %v3447_v56  ;;  %v3485_v10 = vld [vmem:[#allocation16 + $0xb0] sm:$0xf]  ;;  %v3407_v56 = vld [vmem:[#allocation16 + $0x18] sm:$0xf0]  ;;  %v3766_v8 = vor.u32 %v4122_v5, %v3765_v4 }
 0x1aa   : > { %v3486_v13 = vor.u32 %v4051_v11, %v3485_v10  ;;  %v3749_v10 = vld [vmem:[#allocation17 + $0x1c0] sm:$0xf]  ;;  %v4118_v11 = vld [vmem:[#allocation17 + $0x1cc] sm:$0xf0] }
 0x1ab   : > { %1545 = vmatpush.bf16.msra.mxu2 %v3270_v0  ;;  %v4052_v0 = vld [vmem:[#allocation16 + $0xc4] sm:$0xf] }
 0x1ac   : > { %1573 = vmatpush.bf16.msrb.mxu0 %v3274_v2  ;;  %v3495_v2 = vld [vmem:[#allocation16 + $0xc8] sm:$0xf0] }
 0x1ad   : > { %1845 = vmatpush.bf16.msra.mxu1 %v3514_v14  ;;  %1818 = vmatpush.bf16.msrb.mxu3 %v3502_v49  ;;  %v3498_v3 = vor.u32 %v4052_v0, %v3495_v2  ;;  %v3487_v14 = vld [vmem:[#allocation16 + $0xb8] sm:$0xf0]  ;;  %v3462_v49 = vor.u32 %v4045_v47, %v3461_v46  ;;  %v4028_v0 = vld [vmem:[#allocation16 + $0x4] sm:$0xf]  ;;  %v3399_v2 = vld [vmem:[#allocation16 + $0x8] sm:$0xf0] }
 0x1ae   : > { %v3490_v15 = vor.u32 %v4050_v12, %v3487_v14  ;;  %v3751_v14 = vld [vmem:[#allocation17 + $0x1d0] sm:$0xf0] }
 0x1af   : > { %1802 = vmatpush.bf16.msrb.mxu2 %v3454_v43  ;;  %v3414_v43 = vor.u32 %v4033_v41, %v3413_v40  ;;  %v3605_v40 = vld [vmem:[#allocation17 + $0xa0] sm:$0xf]  ;;  %v4082_v41 = vld [vmem:[#allocation17 + $0xac] sm:$0xf0] }
 0x1b0   : > { %1830 = vmatpush.bf16.msra.mxu0 %v3458_v45  ;;  %v3418_v45 = vor.u32 %v4032_v42, %v3415_v44  ;;  %v4080_v42 = vld [vmem:[#allocation17 + $0xa4] sm:$0xf]  ;;  %v3719_v44 = vld [vmem:[#allocation17 + $0x190] sm:$0xf0]  ;;  %v3606_v47 = vor.u32 %v4082_v41, %v3605_v40  ;;  %v3669_v40 = vld [vmem:[#allocation17 + $0x120] sm:$0xf] }
 0x1b1   : > { %1846 = vmatpush.bf16.msra.mxu1 %v3506_v53  ;;  %1819 = vmatpush.bf16.msrb.mxu3 %v3494_v1  ;;  %v4031_v53 = vld [vmem:[#allocation16 + $0x14] sm:$0xf0]  ;;  %v3398_v1 = vor.u32 %v4029_v61, %v3397_v58  ;;  %v4098_v41 = vld [vmem:[#allocation17 + $0x12c] sm:$0xf0] }
 0x1b2   : > { %v3406_v55 = vor.u32 %v4031_v53, %v3405_v52  ;;  %v4076_v52 = vld [vmem:[#allocation17 + $0x84] sm:$0xf]  ;;  %v3591_v53 = vld [vmem:[#allocation17 + $0x90] sm:$0xf0] }
 0x1b3   : > { %1803 = vmatpush.bf16.msrb.mxu2 %v3446_v54  ;;  %v4030_v54 = vld [vmem:[#allocation16 + $0x14] sm:$0xf]  ;;  %v3594_v4 = vor.u32 %v4076_v52, %v3591_v53  ;;  %v4094_v52 = vld [vmem:[#allocation17 + $0x10c] sm:$0xf0] }
 0x1b4   : > { %1831 = vmatpush.bf16.msra.mxu0 %v3450_v57  ;;  %v3410_v57 = vor.u32 %v4030_v54, %v3407_v56  ;;  %v1374_v54 = vperm.slane %v5052_v7, 0  ;;  %v3701_v56 = vld [vmem:[#allocation17 + $0x160] sm:$0xf] }
 0x1b5   : > { %1847 = vmatpush.bf16.msra.mxu1 %v3498_v3  ;;  %1820 = vmatpush.bf16.msrb.mxu3 %v3486_v13  ;;  %v3402_v3 = vor.u32 %v4028_v0, %v3399_v2  ;;  %v4116_v13 = vld [vmem:[#allocation17 + $0x1c4] sm:$0xf] }
 0x1b6   : > { %v4104_v0 = vld [vmem:[#allocation17 + $0x164] sm:$0xf] }
 0x1b7   : > { %1804 = vmatpush.bf16.msrb.mxu2 %v3438_v6  ;;  %v4120_v6 = vld [vmem:[#allocation17 + $0x1e4] sm:$0xf] }
 0x1b8   : > { %1832 = vmatpush.bf16.msra.mxu0 %v3442_v9  ;;  %v3767_v9 = vld [vmem:[#allocation17 + $0x1f0] sm:$0xf0] }
 0x1b9   : > { %1848 = vmatpush.bf16.msra.mxu1 %v3490_v15  ;;  %v3770_v12 = vor.u32 %v4120_v6, %v3767_v9  ;;  %v3637_v15 = vld [vmem:[#allocation17 + $0xe0] sm:$0xf] }
 0x219   : > { %v1329_v16 = vpop.f32.mrf.mxu1 }
 0x21f   : > { %v1315_v17 = vpop.f32.mrf.mxu0  ;;  %v1301_v20 = vpop.f32.mrf.mxu3 }
 0x220   : > { %v1316_v19 = vadd.f32 %v1315_v17, %v1115_v18  ;;  %v4037_v17 = vld [vmem:[#allocation16 + $0x44] sm:$0xf0] }
 0x221   : > { %v1331_v26 = vpop.f32.mrf.mxu1 }
 0x222   : > { %v1330_v24 = vadd.f32 %v1329_v16, %v1316_v19  ;;  %v3429_v16 = vld [vmem:[#allocation16 + $0x40] sm:$0xf] }
 0x223   : > { %v3430_v19 = vor.u32 %v4037_v17, %v3429_v16  ;;  %v3750_v16 = vor.u32 %v4118_v11, %v3749_v10  ;;  %v4090_v17 = vld [vmem:[#allocation17 + $0xec] sm:$0xf0]  ;;  %v3685_v10 = vld [vmem:[#allocation17 + $0x140] sm:$0xf] }
 0x224   : > { %v1335_v29 = vmax.f32 %v1330_v24, 0.0  ;;  %v4102_v11 = vld [vmem:[#allocation17 + $0x14c] sm:$0xf0] }
 0x225   : > { %v1287_v21 = vpop.f32.mrf.mxu2  ;;  %1805 = vmatpush.bf16.msrb.mxu2 %v3430_v19  ;;  %v3639_v19 = vld [vmem:[#allocation17 + $0xf0] sm:$0xf0] }
 0x226   : > { %v1288_v27 = vadd.f32 %v1287_v21, %v1114_v22 }
 0x227   : > { %v1317_v23 = vpop.f32.mrf.mxu0  ;;  %v1303_v35 = vpop.f32.mrf.mxu3 }
 0x228   : > { %v1318_v25 = vadd.f32 %v1317_v23, %v1115_v18  ;;  %v1302_v32 = vadd.f32 %v1301_v20, %v1288_v27  ;;  %v4036_v18 = vld [vmem:[#allocation16 + $0x44] sm:$0xf]  ;;  %v3431_v20 = vld [vmem:[#allocation16 + $0x48] sm:$0xf0]  ;;  %v4049_v23 = vld [vmem:[#allocation16 + $0xa4] sm:$0xf0] }
 0x229   : > { %v3434_v21 = vor.u32 %v4036_v18, %v3431_v20  ;;  %v4088_v18 = vld [vmem:[#allocation17 + $0xe4] sm:$0xf]  ;;  %v3754_v20 = vor.u32 %v4116_v13, %v3751_v14  ;;  %v3687_v14 = vld [vmem:[#allocation17 + $0x150] sm:$0xf0] }
 0x22a   : > { %v1332_v28 = vadd.f32 %v1331_v26, %v1318_v25  ;;  %v1334_v37 = vmax.f32 %v1302_v32, 0.0  ;;  %v4048_v25 = vld [vmem:[#allocation16 + $0xa4] sm:$0xf]  ;;  %v3479_v26 = vld [vmem:[#allocation16 + $0xa8] sm:$0xf0] }
 0x22b   : > { %1833 = vmatpush.bf16.msra.mxu0 %v3434_v21  ;;  %v3482_v27 = vor.u32 %v4048_v25, %v3479_v26  ;;  %v3423_v32 = vld [vmem:[#allocation16 + $0x38] sm:$0xf0]  ;;  %v3638_v21 = vor.u32 %v4090_v17, %v3637_v15  ;;  %v4112_v25 = vld [vmem:[#allocation17 + $0x1a4] sm:$0xf]  ;;  %v3735_v26 = vld [vmem:[#allocation17 + $0x1b0] sm:$0xf0]  ;;  %v815_v17 = vadd.f32 %v5041_v62, %v5041_v62  ;;  %v814_v62 = vadd.f32 %v5037_v59, %v5037_v59 }
 0x22c   : > { %v1337_v30 = vmax.f32 %v1332_v28, 0.0  ;;  %v3421_v28 = vld [vmem:[#allocation16 + $0x30] sm:$0xf]  ;;  %v4100_v13 = vld [vmem:[#allocation17 + $0x144] sm:$0xf]  ;;  %v3670_v59 = vor.u32 %v4098_v41, %v3669_v40 }
 0x22d   : > { %v1289_v31 = vpop.f32.mrf.mxu2  ;;  %1849 = vmatpush.bf16.msra.mxu1 %v3482_v27  ;;  %v3621_v27 = vld [vmem:[#allocation17 + $0xc0] sm:$0xf]  ;;  %v3727_v41 = vld [vmem:[#allocation17 + $0x198] sm:$0xf0] }
 0x22e   : > { %v1339_v33 = vpack.c.bf16 %v1337_v30, %v1335_v29  ;;  %v1290_v34 = vadd.f32 %v1289_v31, %v1114_v22  ;;  %v3477_v22 = vld [vmem:[#allocation16 + $0xa0] sm:$0xf]  ;;  %v4035_v29 = vld [vmem:[#allocation16 + $0x34] sm:$0xf0]  ;;  %v4034_v30 = vld [vmem:[#allocation16 + $0x34] sm:$0xf] }
 0x22f   : > { %v3478_v24 = vor.u32 %v4049_v23, %v3477_v22  ;;  %v3422_v31 = vor.u32 %v4035_v29, %v3421_v28  ;;  %v3642_v22 = vor.u32 %v4088_v18, %v3639_v19  ;;  %v3733_v23 = vld [vmem:[#allocation17 + $0x1a0] sm:$0xf]  ;;  %v4086_v28 = vld [vmem:[#allocation17 + $0xcc] sm:$0xf0]  ;;  %v1375_v29 = vperm.slane %v5052_v7, 1 }
 0x230   : > { %v1304_v36 = vadd.f32 %v1303_v35, %v1290_v34  ;;  %1560 = vmatmul.bf16.vlgmr.msra.gmra.mxu3 %v1339_v33  ;;  %1588 = vmatmul.bf16.vlgmr.msrb.gmra.mxu1 %v1339_v33  ;;  %v3426_v33 = vor.u32 %v4034_v30, %v3423_v32  ;;  %v3469_v34 = vld [vmem:[#allocation16 + $0x90] sm:$0xf]  ;;  %v4047_v35 = vld [vmem:[#allocation16 + $0x94] sm:$0xf0]  ;;  %v3622_v30 = vor.u32 %v4086_v28, %v3621_v27  ;;  %v3623_v32 = vld [vmem:[#allocation17 + $0xd0] sm:$0xf0] }
 0x231   : > { %1821 = vmatpush.bf16.msrb.mxu3 %v3478_v24  ;;  %1806 = vmatpush.bf16.msrb.mxu2 %v3422_v31  ;;  %v4114_v24 = vld [vmem:[#allocation17 + $0x1ac] sm:$0xf0]  ;;  %v4084_v31 = vld [vmem:[#allocation17 + $0xc4] sm:$0xf]  ;;  %v3686_v18 = vor.u32 %v4102_v11, %v3685_v10  ;;  %v817_v19 = vadd.f32 %v5043_v63, %v5043_v63  ;;  %v816_v63 = vadd.f32 %v5039_v60, %v5039_v60  ;;  %v3557_v60 = vld [vmem:[#allocation17 + $0x40] sm:$0xf] }
 0x232   : > { %v1336_v38 = vmax.f32 %v1304_v36, 0.0  ;;  %v4046_v36 = vld [vmem:[#allocation16 + $0x94] sm:$0xf]  ;;  %1834 = vmatpush.bf16.msra.mxu0 %v3426_v33  ;;  %v4119_v10 = vld [vmem:[#allocation17 + $0x1d4] sm:$0xf0] }
 0x233   : > { %v4117_v11 = vld [vmem:[#allocation17 + $0x1cc] sm:$0xf] }
 0x234   : > { %v1338_v39 = vpack.c.bf16 %v1336_v38, %v1334_v37  ;;  %v3470_v37 = vor.u32 %v4047_v35, %v3469_v34  ;;  %v3471_v38 = vld [vmem:[#allocation16 + $0x98] sm:$0xf0]  ;;  %v3734_v35 = vor.u32 %v4114_v24, %v3733_v23 }
 0x235   : > { %1807 = vmatpush.bf16.msrb.mxu2 %v3414_v43  ;;  %v4108_v43 = vld [vmem:[#allocation17 + $0x184] sm:$0xf] }
 0x236   : > { %1546 = vmatmul.bf16.vlgmr.msra.gmra.mxu2 %v1338_v39  ;;  %1574 = vmatmul.bf16.vlgmr.msrb.gmra.mxu0 %v1338_v39  ;;  %v3474_v39 = vor.u32 %v4046_v36, %v3471_v38  ;;  %v3626_v36 = vor.u32 %v4084_v31, %v3623_v32  ;;  %v4110_v38 = vld [vmem:[#allocation17 + $0x18c] sm:$0xf0] }
 0x237   : > { %1822 = vmatpush.bf16.msrb.mxu3 %v3470_v37  ;;  %1835 = vmatpush.bf16.msra.mxu0 %v3418_v45  ;;  %v3717_v37 = vld [vmem:[#allocation17 + $0x180] sm:$0xf]  ;;  %v3607_v45 = vld [vmem:[#allocation17 + $0xb0] sm:$0xf0] }
 0x238   : > { %1850 = vmatpush.bf16.msra.mxu1 %v3474_v39  ;;  %v3738_v39 = vor.u32 %v4112_v25, %v3735_v26  ;;  %v3610_v48 = vor.u32 %v4080_v42, %v3607_v45  ;;  %v3718_v50 = vor.u32 %v4110_v38, %v3717_v37  ;;  %v4072_v37 = vld [vmem:[#allocation17 + $0x64] sm:$0xf] }
 0x239   : > { %1808 = vmatpush.bf16.msrb.mxu2 %v3406_v55  ;;  %v3722_v55 = vor.u32 %v4108_v43, %v3719_v44  ;;  %v4096_v43 = vld [vmem:[#allocation17 + $0x124] sm:$0xf]  ;;  %v3671_v44 = vld [vmem:[#allocation17 + $0x130] sm:$0xf0] }
 0x23a   : > { %v3674_v45 = vor.u32 %v4096_v43, %v3671_v44  ;;  %v4083_v43 = vld [vmem:[#allocation17 + $0xb4] sm:$0xf0]  ;;  %v4081_v44 = vld [vmem:[#allocation17 + $0xac] sm:$0xf] }
 0x23b   : > { %1823 = vmatpush.bf16.msrb.mxu3 %v3462_v49  ;;  %1836 = vmatpush.bf16.msra.mxu0 %v3410_v57  ;;  %v3589_v49 = vld [vmem:[#allocation17 + $0x80] sm:$0xf]  ;;  %v4106_v57 = vld [vmem:[#allocation17 + $0x16c] sm:$0xf0] }
 0x23c   : > { %1851 = vmatpush.bf16.msra.mxu1 %v3466_v51  ;;  %v4078_v51 = vld [vmem:[#allocation17 + $0x8c] sm:$0xf0]  ;;  %v3702_v6 = vor.u32 %v4106_v57, %v3701_v56  ;;  %v3773_v57 = vld [vmem:[#allocation17 + $0x1e8] sm:$0xf] }
 0x23d   : > { %1809 = vmatpush.bf16.msrb.mxu2 %v3398_v1  ;;  %v3703_v1 = vld [vmem:[#allocation17 + $0x170] sm:$0xf0] }
 0x23e   : > { %v3706_v7 = vor.u32 %v4104_v0, %v3703_v1  ;;  %v3775_v1 = vld [vmem:[#allocation17 + $0x1f8] sm:$0xf0] }
 0x23f   : > { %1837 = vmatpush.bf16.msra.mxu0 %v3402_v3  ;;  %2272 = vmatpush.bf16.msra.mxu3 %v3766_v8  ;;  %v3590_v3 = vor.u32 %v4078_v51, %v3589_v49  ;;  %v3653_v51 = vld [vmem:[#allocation17 + $0x100] sm:$0xf] }
 0x240   : > { %2300 = vmatpush.bf16.msrb.mxu1 %v3770_v12  ;;  %v3654_v53 = vor.u32 %v4094_v52, %v3653_v51  ;;  %v3711_v51 = vld [vmem:[#allocation17 + $0x178] sm:$0xf0] }
 0x241   : > { %2258 = vmatpush.bf16.msra.mxu2 %v3638_v21 }
 0x243   : > { %2286 = vmatpush.bf16.msrb.mxu0 %v3642_v22  ;;  %2273 = vmatpush.bf16.msra.mxu3 %v3750_v16  ;;  %v3690_v22 = vor.u32 %v4100_v13, %v3687_v14  ;;  %v3759_v13 = vld [vmem:[#allocation17 + $0x1d8] sm:$0xf0]  ;;  %v3525_v14 = vld [vmem:[#allocation17] sm:$0xf] }
 0x244   : > { %2301 = vmatpush.bf16.msrb.mxu1 %v3754_v20 }
 0x245   : > { %2259 = vmatpush.bf16.msra.mxu2 %v3622_v30 }
 0x247   : > { %2287 = vmatpush.bf16.msrb.mxu0 %v3626_v36  ;;  %2274 = vmatpush.bf16.msra.mxu3 %v3734_v35  ;;  %v3573_v35 = vld [vmem:[#allocation17 + $0x60] sm:$0xf]  ;;  %v4074_v36 = vld [vmem:[#allocation17 + $0x6c] sm:$0xf0] }
 0x248   : > { %2302 = vmatpush.bf16.msrb.mxu1 %v3738_v39  ;;  %v3574_v38 = vor.u32 %v4074_v36, %v3573_v35  ;;  %v3575_v39 = vld [vmem:[#allocation17 + $0x70] sm:$0xf0]  ;;  %v3631_v35 = vld [vmem:[#allocation17 + $0xd8] sm:$0xf0] }
 0x249   : > { %2260 = vmatpush.bf16.msra.mxu2 %v3606_v47  ;;  %v3578_v42 = vor.u32 %v4072_v37, %v3575_v39  ;;  %v4068_v47 = vld [vmem:[#allocation17 + $0x44] sm:$0xf]  ;;  %v3725_v37 = vld [vmem:[#allocation17 + $0x188] sm:$0xf]  ;;  %v4109_v39 = vld [vmem:[#allocation17 + $0x18c] sm:$0xf] }
 0x24b   : > { %2288 = vmatpush.bf16.msrb.mxu0 %v3610_v48  ;;  %2275 = vmatpush.bf16.msra.mxu3 %v3718_v50  ;;  %v3559_v48 = vld [vmem:[#allocation17 + $0x50] sm:$0xf0] }
 0x24c   : > { %2303 = vmatpush.bf16.msrb.mxu1 %v3722_v55  ;;  %v3562_v50 = vor.u32 %v4068_v47, %v3559_v48  ;;  %v3655_v55 = vld [vmem:[#allocation17 + $0x110] sm:$0xf0]  ;;  %v3709_v47 = vld [vmem:[#allocation17 + $0x168] sm:$0xf]  ;;  %v4107_v48 = vld [vmem:[#allocation17 + $0x174] sm:$0xf0] }
 0x24d   : > { %2261 = vmatpush.bf16.msra.mxu2 %v3590_v3  ;;  %v4066_v3 = vld [vmem:[#allocation17 + $0x2c] sm:$0xf0] }
 0x24f   : > { %2289 = vmatpush.bf16.msrb.mxu0 %v3594_v4  ;;  %2276 = vmatpush.bf16.msra.mxu3 %v3702_v6  ;;  %v4064_v6 = vld [vmem:[#allocation17 + $0x24] sm:$0xf] }
 0x250   : > { %2304 = vmatpush.bf16.msrb.mxu1 %v3706_v7  ;;  %v3757_v7 = vld [vmem:[#allocation17 + $0x1c8] sm:$0xf] }
 0x251   : > { %2262 = vmatpush.bf16.msra.mxu2 %v3574_v38  ;;  %v4111_v38 = vld [vmem:[#allocation17 + $0x194] sm:$0xf0] }
 0x252   : > { %v3726_v40 = vor.u32 %v4111_v38, %v3725_v37  ;;  %v3533_v37 = vld [vmem:[#allocation17 + $0x8] sm:$0xf]  ;;  %v4063_v38 = vld [vmem:[#allocation17 + $0x14] sm:$0xf0] }
 0x253   : > { %2277 = vmatpush.bf16.msra.mxu3 %v3686_v18  ;;  %2290 = vmatpush.bf16.msrb.mxu0 %v3578_v42  ;;  %v3527_v18 = vld [vmem:[#allocation17 + $0x10] sm:$0xf0]  ;;  %v3730_v42 = vor.u32 %v4109_v39, %v3727_v41  ;;  %v4061_v39 = vld [vmem:[#allocation17 + $0xc] sm:$0xf]  ;;  %v3535_v41 = vld [vmem:[#allocation17 + $0x18] sm:$0xf0] }
 0x254   : > { %2305 = vmatpush.bf16.msrb.mxu1 %v3690_v22  ;;  %v4091_v22 = vld [vmem:[#allocation17 + $0xf4] sm:$0xf0] }
 0x257   : > { %2278 = vmatpush.bf16.msra.mxu3 %v3670_v59  ;;  %2291 = vmatpush.bf16.msrb.mxu0 %v3562_v50  ;;  %v3613_v59 = vld [vmem:[#allocation17 + $0xa8] sm:$0xf]  ;;  %v3710_v50 = vor.u32 %v4107_v48, %v3709_v47 }
 0x258   : > { %2306 = vmatpush.bf16.msrb.mxu1 %v3674_v45  ;;  %v3615_v45 = vld [vmem:[#allocation17 + $0xb8] sm:$0xf0] }
 0x25b   : > { %2279 = vmatpush.bf16.msra.mxu3 %v3654_v53  ;;  %v3597_v53 = vld [vmem:[#allocation17 + $0x88] sm:$0xf] }
 0x2ad   : > { %v1589_v33 = vpop.f32.mrf.mxu1 }
 0x2b3   : > { %v1575_v34 = vpop.f32.mrf.mxu0  ;;  %v1561_v58 = vpop.f32.mrf.mxu3 }
 0x2b4   : > { %v1576_v46 = vadd.f32 %v1575_v34, %v1375_v29 }
 0x2b5   : > { %v1591_v12 = vpop.f32.mrf.mxu1 }
 0x2b6   : > { %v1590_v2 = vadd.f32 %v1589_v33, %v1576_v46  ;;  %v4070_v46 = vld [vmem:[#allocation17 + $0x4c] sm:$0xf0] }
 0x2b7   : > { %v3558_v49 = vor.u32 %v4070_v46, %v3557_v60  ;;  %v3614_v60 = vor.u32 %v4083_v43, %v3613_v59  ;;  %v3618_v46 = vor.u32 %v4081_v44, %v3615_v45 }
 0x2b8   : > { %v1595_v15 = vmax.f32 %v1590_v2, 0.0  ;;  %v3541_v2 = vld [vmem:[#allocation17 + $0x20] sm:$0xf] }
 0x2b9   : > { %v1547_v61 = vpop.f32.mrf.mxu2  ;;  %2263 = vmatpush.bf16.msra.mxu2 %v3558_v49  ;;  %v4105_v49 = vld [vmem:[#allocation17 + $0x16c] sm:$0xf] }
 0x2ba   : > { %v1548_v8 = vadd.f32 %v1547_v61, %v1374_v54  ;;  %v1599_v24 = vadd.f32 %v1595_v15, %v815_v17  ;;  %v4121_v61 = vld [vmem:[#allocation17 + $0x1ec] sm:$0xf]  ;;  %v3762_v15 = vor.u32 %v4117_v11, %v3759_v13  ;;  %v4060_v17 = vld [vmem:[#allocation17 + $0x4] sm:$0xf]  ;;  %v3714_v52 = vor.u32 %v4105_v49, %v3711_v51  ;;  %v4099_v11 = vld [vmem:[#allocation17 + $0x134] sm:$0xf0] }
 0x2bb   : > { %v1577_v5 = vpop.f32.mrf.mxu0  ;;  %v1563_v27 = vpop.f32.mrf.mxu3  ;;  %v3778_v4 = vor.u32 %v4121_v61, %v3775_v1  ;;  %v3693_v61 = vld [vmem:[#allocation17 + $0x148] sm:$0xf]  ;;  %v4101_v1 = vld [vmem:[#allocation17 + $0x14c] sm:$0xf] }
 0x2bc   : > { %v1578_v9 = vadd.f32 %v1577_v5, %v1375_v29  ;;  %v1562_v20 = vadd.f32 %v1561_v58, %v1548_v8  ;;  %v4123_v58 = vld [vmem:[#allocation17 + $0x1f4] sm:$0xf0]  ;;  %v3542_v5 = vor.u32 %v4066_v3, %v3541_v2  ;;  %v3543_v8 = vld [vmem:[#allocation17 + $0x30] sm:$0xf0]  ;;  %v3695_v3 = vld [vmem:[#allocation17 + $0x158] sm:$0xf0] }
 0x2bd   : > { %v3774_v0 = vor.u32 %v4123_v58, %v3773_v57  ;;  %v3599_v57 = vld [vmem:[#allocation17 + $0x98] sm:$0xf0] }
 0x2be   : > { %v1592_v16 = vadd.f32 %v1591_v12, %v1578_v9  ;;  %v1594_v28 = vmax.f32 %v1562_v20, 0.0  ;;  %v3546_v9 = vor.u32 %v4064_v6, %v3543_v8  ;;  %2264 = vmatpush.bf16.msra.mxu2 %v3542_v5  ;;  %v3758_v12 = vor.u32 %v4119_v10, %v3757_v7  ;;  %v3581_v5 = vld [vmem:[#allocation17 + $0x68] sm:$0xf]  ;;  %v4075_v6 = vld [vmem:[#allocation17 + $0x74] sm:$0xf0] }
 0x2bf   : > { %v3530_v20 = vor.u32 %v4060_v17, %v3527_v18  ;;  %v4073_v8 = vld [vmem:[#allocation17 + $0x6c] sm:$0xf]  ;;  %v3583_v7 = vld [vmem:[#allocation17 + $0x78] sm:$0xf0]  ;;  %v3677_v10 = vld [vmem:[#allocation17 + $0x128] sm:$0xf] }
 0x2c0   : > { %v1597_v21 = vmax.f32 %v1592_v16, 0.0  ;;  %v1598_v32 = vadd.f32 %v1594_v28, %v814_v62  ;;  %2292 = vmatpush.bf16.msrb.mxu0 %v3546_v9  ;;  %v4062_v16 = vld [vmem:[#allocation17 + $0xc] sm:$0xf0]  ;;  %v3743_v62 = vld [vmem:[#allocation17 + $0x1b8] sm:$0xf0]  ;;  %v3582_v9 = vor.u32 %v4075_v6, %v3581_v5  ;;  %v3678_v13 = vor.u32 %v4099_v11, %v3677_v10  ;;  %v4137_v5 = vld [vmem:[#allocation19 + $0x68] sm:$0xff] }
 0x2c1   : > { %v1549_v23 = vpop.f32.mrf.mxu2  ;;  %v4071_v18 = vld [vmem:[#allocation17 + $0x54] sm:$0xf0]  ;;  %v4130_v6 = vld [vmem:[#allocation19 + $0x30] sm:$0xff]  ;;  %v4128_v11 = vld [vmem:[#allocation19 + $0x20] sm:$0xff] }
 0x2c2   : > { %v1601_v25 = vadd.f32 %v1597_v21, %v817_v19  ;;  %v1550_v26 = vadd.f32 %v1549_v23, %v1374_v54  ;;  %v4092_v54 = vld [vmem:[#allocation17 + $0x104] sm:$0xf]  ;;  %v3526_v19 = vor.u32 %v4062_v16, %v3525_v14  ;;  %v3645_v21 = vld [vmem:[#allocation17 + $0xe8] sm:$0xf]  ;;  %v4089_v23 = vld [vmem:[#allocation17 + $0xec] sm:$0xf] }
 0x2c3   : > { %v3658_v56 = vor.u32 %v4092_v54, %v3655_v55  ;;  %v4079_v54 = vld [vmem:[#allocation17 + $0x94] sm:$0xf0]  ;;  %v4077_v55 = vld [vmem:[#allocation17 + $0x8c] sm:$0xf]  ;;  %v3565_v16 = vld [vmem:[#allocation17 + $0x48] sm:$0xf] }
 0x2c4   : > { %v1603_v29 = vpack.c.bf16 %v1601_v25, %v1599_v24  ;;  %v1564_v30 = vadd.f32 %v1563_v27, %v1550_v26  ;;  %v3646_v24 = vor.u32 %v4091_v22, %v3645_v21  ;;  %v3647_v25 = vld [vmem:[#allocation17 + $0xf8] sm:$0xf0]  ;;  %v3741_v26 = vld [vmem:[#allocation17 + $0x1a8] sm:$0xf]  ;;  %v4115_v27 = vld [vmem:[#allocation17 + $0x1b4] sm:$0xf0]  ;;  %2265 = vmatpush.bf16.msra.mxu2 %v3526_v19  ;;  %2293 = vmatpush.bf16.msrb.mxu0 %v3530_v20 }
 0x2c5   : > { %2307 = vmatpush.bf16.msrb.mxu1 %v3658_v56  ;;  %v3650_v28 = vor.u32 %v4089_v23, %v3647_v25  ;;  %v3598_v56 = vor.u32 %v4079_v54, %v3597_v53  ;;  %v3602_v58 = vor.u32 %v4077_v55, %v3599_v57  ;;  %v4097_v14 = vld [vmem:[#allocation17 + $0x12c] sm:$0xf]  ;;  %v3567_v20 = vld [vmem:[#allocation17 + $0x58] sm:$0xf0]  ;;  %v3566_v21 = vor.u32 %v4071_v18, %v3565_v16  ;;  %v3661_v22 = vld [vmem:[#allocation17 + $0x108] sm:$0xf] }
 0x2c6   : > { %v1596_v31 = vmax.f32 %v1564_v30, 0.0  ;;  %1824 = vmatmul.bf16.vlgmr.msrb.gmra.mxu3 %v1603_v29  ;;  %1852 = vmatmul.bf16.vlgmr.msra.gmra.mxu1 %v1603_v29  ;;  %v3742_v29 = vor.u32 %v4115_v27, %v3741_v26  ;;  %v4113_v30 = vld [vmem:[#allocation17 + $0x1ac] sm:$0xf]  ;;  %v4095_v23 = vld [vmem:[#allocation17 + $0x114] sm:$0xf0]  ;;  %v4126_v18 = vld [vmem:[#allocation19 + $0x10] sm:$0xff] }
 0x2c7   : > { %2328 = vmatpush.bf16.msrb.mxu3 %v3774_v0  ;;  %v4103_v0 = vld [vmem:[#allocation17 + $0x154] sm:$0xf0]  ;;  %v4069_v19 = vld [vmem:[#allocation17 + $0x4c] sm:$0xf]  ;;  %v3663_v26 = vld [vmem:[#allocation17 + $0x118] sm:$0xf0] }
 0x2c8   : > { %v1600_v33 = vadd.f32 %v1596_v31, %v816_v63  ;;  %v3746_v63 = vor.u32 %v4113_v30, %v3743_v62  ;;  %v3629_v31 = vld [vmem:[#allocation17 + $0xc8] sm:$0xf]  ;;  %v3694_v2 = vor.u32 %v4103_v0, %v3693_v61  ;;  %v3570_v25 = vor.u32 %v4069_v19, %v3567_v20  ;;  %v4065_v30 = vld [vmem:[#allocation17 + $0x2c] sm:$0xf]  ;;  %v3551_v62 = vld [vmem:[#allocation17 + $0x38] sm:$0xf0] }
 0x2c9   : > { %2356 = vmatpush.bf16.msra.mxu1 %v3778_v4  ;;  %v3698_v4 = vor.u32 %v4101_v1, %v3695_v3  ;;  %v3549_v27 = vld [vmem:[#allocation17 + $0x28] sm:$0xf]  ;;  %v4139_v54 = vld [vmem:[#allocation19 + $0x78] sm:$0xff]  ;;  %v4138_v0 = vld [vmem:[#allocation19 + $0x70] sm:$0xff] }
 0x2ca   : > { %v1602_v34 = vpack.c.bf16 %v1600_v33, %v1598_v32  ;;  %v4087_v32 = vld [vmem:[#allocation17 + $0xd4] sm:$0xf0]  ;;  %v4085_v33 = vld [vmem:[#allocation17 + $0xcc] sm:$0xf]  ;;  %v4146_v19 = vld [vmem:[#allocation19 + $0xb0] sm:$0xff] }
 0x2cb   : > { %2329 = vmatpush.bf16.msrb.mxu3 %v3758_v12  ;;  %v3634_v36 = vor.u32 %v4085_v33, %v3631_v35  ;;  %v3586_v12 = vor.u32 %v4073_v8, %v3583_v7  ;;  %v3554_v33 = vor.u32 %v4065_v30, %v3551_v62  ;;  %v4131_v3 = vld [vmem:[#allocation19 + $0x38] sm:$0xff]  ;;  %v4136_v8 = vld [vmem:[#allocation19 + $0x60] sm:$0xff]  ;;  %v4133_v16 = vld [vmem:[#allocation19 + $0x48] sm:$0xff] }
 0x2cc   : > { %1810 = vmatmul.bf16.vlgmr.msrb.gmra.mxu2 %v1602_v34  ;;  %1838 = vmatmul.bf16.vlgmr.msra.gmra.mxu0 %v1602_v34  ;;  %v3630_v34 = vor.u32 %v4087_v32, %v3629_v31  ;;  %v4135_v7 = vld [vmem:[#allocation19 + $0x58] sm:$0xff]  ;;  %v4132_v20 = vld [vmem:[#allocation19 + $0x40] sm:$0xff]  ;;  %v4142_v30 = vld [vmem:[#allocation19 + $0x90] sm:$0xff] }
 0x2cd   : > { %2357 = vmatpush.bf16.msra.mxu1 %v3762_v15  ;;  %2314 = vmatpush.bf16.msrb.mxu2 %v3646_v24  ;;  %v3679_v15 = vld [vmem:[#allocation17 + $0x138] sm:$0xf0]  ;;  %v4093_v24 = vld [vmem:[#allocation17 + $0x10c] sm:$0xf]  ;;  %v4148_v62 = vld [vmem:[#allocation19 + $0xc0] sm:$0xff] }
 0x2ce   : > { %2342 = vmatpush.bf16.msra.mxu0 %v3650_v28  ;;  %v3682_v17 = vor.u32 %v4097_v14, %v3679_v15  ;;  %v4067_v28 = vld [vmem:[#allocation17 + $0x34] sm:$0xf0]  ;;  %v3666_v31 = vor.u32 %v4093_v24, %v3663_v26  ;;  %v4144_v26 = vld [vmem:[#allocation19 + $0xa0] sm:$0xff] }
 0x2cf   : > { %2330 = vmatpush.bf16.msrb.mxu3 %v3742_v29  ;;  %v3662_v29 = vor.u32 %v4095_v23, %v3661_v22  ;;  %v3550_v32 = vor.u32 %v4067_v28, %v3549_v27  ;;  %v4155_v10 = vld [vmem:[#allocation19 + $0xf8] sm:$0xff]  ;;  %v4125_v22 = vld [vmem:[#allocation19 + $0x8] sm:$0xff]  ;;  %v4150_v27 = vld [vmem:[#allocation19 + $0xd0] sm:$0xff] }
 0x2d0   : > { %v4127_v14 = vld [vmem:[#allocation19 + $0x18] sm:$0xff]  ;;  %v4145_v23 = vld [vmem:[#allocation19 + $0xa8] sm:$0xff] }
 0x2d1   : > { %2358 = vmatpush.bf16.msra.mxu1 %v3746_v63  ;;  %2315 = vmatpush.bf16.msrb.mxu2 %v3630_v34  ;;  %v1636_v63 = vld [vmem:[%s5157_s1] sm:$0x3]  ;;  %v4147_v15 = vld [vmem:[#allocation19 + $0xb8] sm:$0xff]  ;;  %s2731_s1 = scalar_lea.sflag [#allocation4], %s5006_s10 }
 0x2d2   : > { %2343 = vmatpush.bf16.msra.mxu0 %v3634_v36  ;;  %v1639_v35 = vperm.slane %v1636_v63, 1  ;;  %v4151_v24 = vld [vmem:[#allocation19 + $0xd8] sm:$0xff] }
 0x2d3   : > { %2331 = vmatpush.bf16.msrb.mxu3 %v3726_v40  ;;  %v3534_v40 = vor.u32 %v4063_v38, %v3533_v37  ;;  %v4143_v28 = vld [vmem:[#allocation19 + $0x98] sm:$0xff] }
 0x2d5   : > { %2359 = vmatpush.bf16.msra.mxu1 %v3730_v42  ;;  %2316 = vmatpush.bf16.msrb.mxu2 %v3614_v60  ;;  %v3538_v42 = vor.u32 %v4061_v39, %v3535_v41  ;;  %v1638_v60 = vperm.slane %v1636_v63, 0 }
 0x2d6   : > { %2344 = vmatpush.bf16.msra.mxu0 %v3618_v46 }
 0x2d7   : > { %2332 = vmatpush.bf16.msrb.mxu3 %v3710_v50 }
 0x2d9   : > { %2360 = vmatpush.bf16.msra.mxu1 %v3714_v52  ;;  %2317 = vmatpush.bf16.msrb.mxu2 %v3598_v56 }
 0x2da   : > { %2345 = vmatpush.bf16.msra.mxu0 %v3602_v58 }
 0x2db   : > { %2333 = vmatpush.bf16.msrb.mxu3 %v3694_v2 }
 0x2dd   : > { %2361 = vmatpush.bf16.msra.mxu1 %v3698_v4  ;;  %2318 = vmatpush.bf16.msrb.mxu2 %v3582_v9  ;;  %v4129_v9 = vld [vmem:[#allocation19 + $0x28] sm:$0xff] }
 0x2de   : > { %2346 = vmatpush.bf16.msra.mxu0 %v3586_v12  ;;  %v4134_v12 = vld [vmem:[#allocation19 + $0x50] sm:$0xff] }
 0x2df   : > { %2334 = vmatpush.bf16.msrb.mxu3 %v3678_v13  ;;  %v4154_v13 = vld [vmem:[#allocation19 + $0xf0] sm:$0xff] }
 0x2e1   : > { %2362 = vmatpush.bf16.msra.mxu1 %v3682_v17  ;;  %2319 = vmatpush.bf16.msrb.mxu2 %v3566_v21  ;;  %v4153_v17 = vld [vmem:[#allocation19 + $0xe8] sm:$0xff]  ;;  %v4152_v21 = vld [vmem:[#allocation19 + $0xe0] sm:$0xff] }
 0x2e2   : > { %2347 = vmatpush.bf16.msra.mxu0 %v3570_v25  ;;  %v4124_v25 = vld [vmem:[#allocation19] sm:$0xff] }
 0x2e3   : > { %2335 = vmatpush.bf16.msrb.mxu3 %v3662_v29  ;;  %v4149_v29 = vld [vmem:[#allocation19 + $0xc8] sm:$0xff] }
 0x2e5   : > { %2363 = vmatpush.bf16.msra.mxu1 %v3666_v31  ;;  %2320 = vmatpush.bf16.msrb.mxu2 %v3550_v32  ;;  %v4141_v31 = vld [vmem:[#allocation19 + $0x88] sm:$0xff] }
 0x2e6   : > { %2348 = vmatpush.bf16.msra.mxu0 %v3554_v33  ;;  %v1928_v32 = vld [vmem:[%s5158_s15] sm:$0xf] }
 0x2e7   : > { %v1930_v41 = vperm.slane %v1928_v32, 0 }
 0x2e9   : > { %2321 = vmatpush.bf16.msrb.mxu2 %v3534_v40 }
 0x2ea   : > { %2349 = vmatpush.bf16.msra.mxu0 %v3538_v42 }
 0x343   : > { %v1853_v34 = vpop.f32.mrf.mxu1 }
 0x349   : > { %v1839_v36 = vpop.f32.mrf.mxu0  ;;  %v1825_v43 = vpop.f32.mrf.mxu3 }
 0x34a   : > { %v1840_v59 = vadd.f32 %v1839_v36, %v1639_v35  ;;  %v1931_v36 = vperm.slane %v1928_v32, 1 }
 0x34b   : > { %v1855_v48 = vpop.f32.mrf.mxu1 }
 0x34c   : > { %v1854_v46 = vadd.f32 %v1853_v34, %v1840_v59  ;;  %v4140_v34 = vld [vmem:[#allocation19 + $0x80] sm:$0xff] }
 0x34e   : > { %v1859_v51 = vmax.f32 %v1854_v46, 0.0 }
 0x34f   : > { %v1811_v44 = vpop.f32.mrf.mxu2 }
 0x350   : > { %v1812_v49 = vadd.f32 %v1811_v44, %v1638_v60 }
 0x351   : > { %v1841_v45 = vpop.f32.mrf.mxu0  ;;  %v1827_v58 = vpop.f32.mrf.mxu3 }
 0x352   : > { %v1842_v47 = vadd.f32 %v1841_v45, %v1639_v35  ;;  %v1826_v55 = vadd.f32 %v1825_v43, %v1812_v49 }
 0x354   : > { %v1856_v50 = vadd.f32 %v1855_v48, %v1842_v47  ;;  %v1858_v1 = vmax.f32 %v1826_v55, 0.0 }
 0x356   : > { %v1861_v52 = vmax.f32 %v1856_v50, 0.0 }
 0x357   : > { %v1813_v53 = vpop.f32.mrf.mxu2 }
 0x358   : > { %v1863_v56 = vpack.c.bf16 %v1861_v52, %v1859_v51  ;;  %v1814_v57 = vadd.f32 %v1813_v53, %v1638_v60  ;;  %v1933_v53 = vperm.slane %v1928_v32, 3 }
 0x35a   : > { %v1828_v61 = vadd.f32 %v1827_v58, %v1814_v57  ;;  %2280 = vmatmul.bf16.vlgmr.msra.gmra.mxu3 %v1863_v56  ;;  %2308 = vmatmul.bf16.vlgmr.msrb.gmra.mxu1 %v1863_v56  ;;  %v1932_v58 = vperm.slane %v1928_v32, 2 }
 0x35b   : > { %2648 = vmatpush.bf16.msra.mxu3 %v4139_v54  ;;  %2676 = vmatpush.bf16.msrb.mxu1 %v4155_v10 }
 0x35c   : > { %v1860_v2 = vmax.f32 %v1828_v61, 0.0 }
 0x35e   : > { %v1862_v4 = vpack.c.bf16 %v1860_v2, %v1858_v1 }
 0x35f   : > { %2649 = vmatpush.bf16.msra.mxu3 %v4138_v0  ;;  %2677 = vmatpush.bf16.msrb.mxu1 %v4154_v13 }
 0x360   : > { %2266 = vmatmul.bf16.vlgmr.msra.gmra.mxu2 %v1862_v4  ;;  %2294 = vmatmul.bf16.vlgmr.msrb.gmra.mxu0 %v1862_v4 }
 0x361   : > { %2634 = vmatpush.bf16.msra.mxu2 %v4131_v3  ;;  %2662 = vmatpush.bf16.msrb.mxu0 %v4147_v15 }
 0x363   : > { %2650 = vmatpush.bf16.msra.mxu3 %v4137_v5  ;;  %2678 = vmatpush.bf16.msrb.mxu1 %v4153_v17 }
 0x365   : > { %2635 = vmatpush.bf16.msra.mxu2 %v4130_v6  ;;  %2663 = vmatpush.bf16.msrb.mxu0 %v4146_v19 }
 0x367   : > { %2651 = vmatpush.bf16.msra.mxu3 %v4136_v8  ;;  %2679 = vmatpush.bf16.msrb.mxu1 %v4152_v21 }
 0x369   : > { %2636 = vmatpush.bf16.msra.mxu2 %v4129_v9  ;;  %2664 = vmatpush.bf16.msrb.mxu0 %v4145_v23 }
 0x36a   : > { %2336 = vmatmul.bf16.vlgmr.msrb.gmra.mxu3 %v1863_v56  ;;  %2364 = vmatmul.bf16.vlgmr.msra.gmra.mxu1 %v1863_v56 }
 0x36b   : > { %2652 = vmatpush.bf16.msra.mxu3 %v4135_v7  ;;  %2680 = vmatpush.bf16.msrb.mxu1 %v4151_v24 }
 0x36d   : > { %2637 = vmatpush.bf16.msra.mxu2 %v4128_v11  ;;  %2665 = vmatpush.bf16.msrb.mxu0 %v4144_v26 }
 0x36f   : > { %2653 = vmatpush.bf16.msra.mxu3 %v4134_v12  ;;  %2681 = vmatpush.bf16.msrb.mxu1 %v4150_v27  ;;  %v4312_v12 = vld [vmem:[%s5159_s6] ss:$0 sm:$0xff] }
 0x370   : > { %2322 = vmatmul.bf16.vlgmr.msrb.gmra.mxu2 %v1862_v4  ;;  %2350 = vmatmul.bf16.vlgmr.msra.gmra.mxu0 %v1862_v4 }
 0x371   : > { %2638 = vmatpush.bf16.msra.mxu2 %v4127_v14  ;;  %2666 = vmatpush.bf16.msrb.mxu0 %v4143_v28 }
 0x373   : > { %2654 = vmatpush.bf16.msra.mxu3 %v4133_v16  ;;  %2682 = vmatpush.bf16.msrb.mxu1 %v4149_v29 }
 0x375   : > { %2639 = vmatpush.bf16.msra.mxu2 %v4126_v18  ;;  %2667 = vmatpush.bf16.msrb.mxu0 %v4142_v30 }
 0x377   : > { %2655 = vmatpush.bf16.msra.mxu3 %v4132_v20  ;;  %2683 = vmatpush.bf16.msrb.mxu1 %v4148_v62 }
 0x379   : > { %2640 = vmatpush.bf16.msra.mxu2 %v4125_v22  ;;  %2668 = vmatpush.bf16.msrb.mxu0 %v4141_v31 }
 0x37d   : > { %2641 = vmatpush.bf16.msra.mxu2 %v4124_v25  ;;  %2669 = vmatpush.bf16.msrb.mxu0 %v4140_v34 }
 0x3d7   : > { %v2309_v63 = vpop.f32.mrf.mxu1 }
 0x3dd   : > { %v2295_v33 = vpop.f32.mrf.mxu0  ;;  %v2281_v35 = vpop.f32.mrf.mxu3 }
 0x3de   : > { %v2296_v39 = vadd.f32 %v2295_v33, %v1931_v36 }
 0x3df   : > { %v2311_v37 = vpop.f32.mrf.mxu1 }
 0x3e0   : > { %v2310_v59 = vadd.f32 %v2309_v63, %v2296_v39 }
 0x3e3   : > { %v2267_v38 = vpop.f32.mrf.mxu2 }
 0x3e4   : > { %v2268_v60 = vadd.f32 %v2267_v38, %v1930_v41 }
 0x3e5   : > { %v2297_v40 = vpop.f32.mrf.mxu0  ;;  %v2283_v44 = vpop.f32.mrf.mxu3 }
 0x3e6   : > { %v2298_v42 = vadd.f32 %v2297_v40, %v1931_v36  ;;  %v2282_v50 = vadd.f32 %v2281_v35, %v2268_v60 }
 0x3e7   : > { %v2365_v48 = vpop.f32.mrf.mxu1 }
 0x3e8   : > { %v2312_v43 = vadd.f32 %v2311_v37, %v2298_v42 }
 0x3ea   : > { %v2371_v45 = vpack.c.bf16 %v2312_v43, %v2310_v59 }
 0x3eb   : > { %v2269_v46 = vpop.f32.mrf.mxu2 }
 0x3ec   : > { %v2270_v47 = vadd.f32 %v2269_v46, %v1930_v41  ;;  %2656 = vmatmul.bf16.vlgmr.msra.gmra.mxu3 %v2371_v45 }
 0x3ed   : > { %v2351_v49 = vpop.f32.mrf.mxu0  ;;  %v2337_v54 = vpop.f32.mrf.mxu3 }
 0x3ee   : > { %v2284_v51 = vadd.f32 %v2283_v44, %v2270_v47  ;;  %v2352_v56 = vadd.f32 %v2351_v49, %v1933_v53 }
 0x3ef   : > { %v2367_v0 = vpop.f32.mrf.mxu1 }
 0x3f0   : > { %v2370_v52 = vpack.c.bf16 %v2284_v51, %v2282_v50  ;;  %v2366_v1 = vadd.f32 %v2365_v48, %v2352_v56 }
 0x3f2   : > { %2642 = vmatmul.bf16.vlgmr.msra.gmra.mxu2 %v2370_v52 }
 0x3f3   : > { %v2323_v55 = vpop.f32.mrf.mxu2 }
 0x3f4   : > { %v2324_v3 = vadd.f32 %v2323_v55, %v1932_v58 }
 0x3f5   : > { %v2353_v57 = vpop.f32.mrf.mxu0  ;;  %v2339_v8 = vpop.f32.mrf.mxu3 }
 0x3f6   : > { %v2354_v61 = vadd.f32 %v2353_v57, %v1933_v53  ;;  %v2338_v9 = vadd.f32 %v2337_v54, %v2324_v3 }
 0x3f8   : > { %v2368_v2 = vadd.f32 %v2367_v0, %v2354_v61 }
 0x3fa   : > { %v2373_v4 = vpack.c.bf16 %v2368_v2, %v2366_v1 }
 0x3fb   : > { %v2325_v5 = vpop.f32.mrf.mxu2 }
 0x3fc   : > { %v2326_v6 = vadd.f32 %v2325_v5, %v1932_v58  ;;  %2684 = vmatmul.bf16.vlgmr.msrb.gmra.mxu1 %v2373_v4 }
 0x3fe   : > { %v2340_v7 = vadd.f32 %v2339_v8, %v2326_v6 }
 0x400   : > { %v2372_v10 = vpack.c.bf16 %v2340_v7, %v2338_v9 }
 0x402   : > { %2670 = vmatmul.bf16.vlgmr.msrb.gmra.mxu0 %v2372_v10 }
 0x46f   : > { %v2657_v14 = vpop.f32.mrf.mxu3 }
 0x475   : > { %v2643_v11 = vpop.f32.mrf.mxu2 }
 0x476   : > { %v2644_v13 = vadd.f32 %v4312_v12, %v2643_v11 }
 0x477   : > { %v2659_v23 = vpop.f32.mrf.mxu3 }
 0x478   : > { %v2658_v16 = vadd.f32 %v2657_v14, %v2644_v13 }
 0x479   : > { %v2685_v15 = vpop.f32.mrf.mxu1 }
 0x47d   : > { %v2645_v17 = vpop.f32.mrf.mxu2 }
 0x47e   : > { %v2646_v20 = vadd.f32 %v4312_v12, %v2645_v17 }
 0x47f   : > { %v2671_v18 = vpop.f32.mrf.mxu0 }
 0x480   : > { %v2672_v19 = vadd.f32 %v2671_v18, %v2658_v16  ;;  %v2660_v24 = vadd.f32 %v2659_v23, %v2646_v20 }
 0x481   : > { %v2687_v27 = vpop.f32.mrf.mxu1 }
 0x482   : > { %v2686_v21 = vadd.f32 %v2685_v15, %v2672_v19 }
 0x484   : > { %v3907_v22 = vmul.f32 -1.442695, %v2686_v21 }
 0x486   : > { %4313 = vpow2.f32 %v3907_v22 }
 0x487   : > { %v2673_v25 = vpop.f32.mrf.mxu0 }
 0x488   : > { %v2674_v26 = vadd.f32 %v2673_v25, %v2660_v24 }
 0x48a   : > { %v2688_v28 = vadd.f32 %v2687_v27, %v2674_v26 }
 0x48c   : > { %v4314_v29 = vpop.eup %4313  ;;  %v3908_v30 = vmul.f32 -1.442695, %v2688_v28 }
 0x48d   : > { %v2696_v62 = vadd.f32 1.0, %v4314_v29 }
 0x48e   : > { %4315 = vpow2.f32 %v3908_v30 }
 0x48f   : > { %4317 = vrcp.f32 %v2696_v62  ;;  %v2709_v35 = vand.u32 2147483648, %v2696_v62  ;;  %v2707_v37 = vand.u32 2147483647, %v2696_v62  ;;  %vm2703_vm1 = vweird.f32 %v2696_v62 }
 0x491   : > { %v2710_v40 = vor.u32 1.1754944e-38, %v2709_v35  ;;  %vm2708_vm3 = vcmp.eq.f32.partialorder %v2707_v37, 8.507059e+37 }
 0x494   : > { %v4316_v63 = vpop.eup %4315 }
 0x495   : > { %v4318_v31 = vpop.eup %4317  ;;  %v2697_v32 = vadd.f32 1.0, %v4316_v63 }
 0x496   : > { %v2699_v33 = vmul.f32 %v4318_v31, %v2696_v62  ;;  %vm2704_vm0 = vweird.f32 %v4318_v31 }
 0x497   : > { %4319 = vrcp.f32 %v2697_v32  ;;  %vm2705_vm2 = vmor %vm2703_vm1, %vm2704_vm0  ;;  %v2724_v44 = vand.u32 2147483648, %v2697_v32  ;;  %v2722_v45 = vand.u32 2147483647, %v2697_v32  ;;  %vm2718_vm5 = vweird.f32 %v2697_v32 }
 0x498   : > { %v2700_v34 = vsub.f32 1.0, %v2699_v33 }
 0x499   : > { %v2725_v47 = vor.u32 1.1754944e-38, %v2724_v44  ;;  %vm2723_vm7 = vcmp.eq.f32.partialorder %v2722_v45, 8.507059e+37 }
 0x49a   : > { %v2701_v36 = vmul.f32 %v4318_v31, %v2700_v34 }
 0x49c   : > { %v2702_v38 = vadd.f32 %v4318_v31, %v2701_v36 }
 0x49d   : > { %v4320_v39 = vpop.eup %4319 }
 0x49e   : > { %v2714_v41 = vmul.f32 %v4320_v39, %v2697_v32  ;;  %v2706_v42 = vsel %vm2705_vm2, %v4318_v31, %v2702_v38  ;;  %vm2719_vm4 = vweird.f32 %v4320_v39 }
 0x49f   : > { %v2711_v59 = vsel %vm2708_vm3, %v2710_v40, %v2706_v42  ;;  %vm2720_vm6 = vmor %vm2718_vm5, %vm2719_vm4 }
 0x4a0   : > { %v2715_v43 = vsub.f32 1.0, %v2714_v41  ;;  %2728 = vst [vmem:[%s673_s30] sm:$0xff] %v2711_v59 }
 0x4a2   : > { %v2716_v60 = vmul.f32 %v4320_v39, %v2715_v43 }
 0x4a4   : > { %v2717_v46 = vadd.f32 %v4320_v39, %v2716_v60 }
 0x4a6   : > { %v2721_v48 = vsel %vm2720_vm6, %v4320_v39, %v2717_v46 }
 0x4a7   : > { %v2726_v49 = vsel %vm2723_vm7, %v2725_v47, %v2721_v48 }
 0x4a8   : > { %2729 = vst [vmem:[%s673_s30 + $0x8] sm:$0xff] %v2726_v49 }
 0x4a9   : > { %4678 = shalt.err (!%p4675_p9)
}
 0x4aa   : > { %s4755_s10 = smov 128   ;;  %s4756_s5 = smov 8  }
 0x4ab   : > { %4199 = dma.vmem_to_hbm [thread:$0]  (%p4972_p4), %s2744_s25, 256, %s2746_s14, %s2731_s1, %s4755_s10, %s4755_s10, %s4756_s5  }
 0x4ac PF: > { %s2760_s7 = sand.u32 1, %s4725_s18   ;;  %p5161_p10 = scmp.ge.s32.totalorder %s4737_s21, 2 }
 0x4ad   : > { %s2761_s22 = scalar_lea.sflag [#allocation4], %s2760_s7 }
 0x4ae   : > { %p4237_p13 = pnand %p5161_p10, %p4976_p6 }
 0x4b0   : > { %p4238_p11 = pneg %p4237_p13 }
 0x4b2   : > { %4720 = dma.done.wait (%p4238_p11), %s2761_s22, 256  }
 0x4b3   : > { %4722 = vsyncadd (%p4238_p11), %s2761_s22, 4294967040  ;;  %p33_p0 = scmp.ge.s32.totalorder %s4946_s23, 4   ;;  %s5162_s18 = smov %s4729_s19 }
 0x4b4   : > { %s5163_s19 = smov %s4733_s20  ;;  %s5164_s20 = smov %s4957_s16 }
 0x4b5   : > { %s5165_s21 = smov %s4946_s23  ;;  %35 = sbr.rel (!%p33_p0) target bundleno = 21 (0x15), region = 165 }
 0x4ba   :  { %2767 = vsyncpa [#allocation3], 1 }
 0x4bb   :  { %2769 = vsyncpa [#allocation3 + $0x1], 1 }
 0x4bc   :  { %2770 = vsyncpa [#allocation6], 1 }
 0x4bd   :  { %2771 = vsyncpa [#allocation9], 1 }
 0x4be   :  { %2772 = vsyncpa [#allocation12], 1 }
 0x4bf   :  { %2773 = vsyncpa [#allocation15], 1 }
 0x4c0   :  { %2774 = vsyncpa [#allocation18], 1 }
 0x4c1   :  { %2775 = vsyncpa [#allocation4], 1 }
 0x4c2   :  { %2777 = vsyncpa [#allocation4 + $0x1], 1 }

</bundles_post_ra>
